<compile_context>
chip_gen: v6e
topology: v6e:2x2x1
jax: 0.10.0
libtpu: 0.0.40
codegen_flags: <defaults>
</compile_context>

<pallas_src>
import functools

import jax
import jax.numpy as jnp
from jax.experimental import pallas as pl
from jax.experimental.pallas import tpu as pltpu

NEG_SLOPE = 0.2          # GATConv_2 default negative_slope
_MIB = 1024 * 1024
_TILE_CANDIDATES = (512, 256, 128, 64, 32, 16, 8)


def _round_up(x, m):
    return ((x + m - 1) // m) * m


def _vmem_limits():
    """Derive (vmem_limit_bytes, tile_budget_bytes) from the actual part's VMEM capacity."""
    try:
        cap = int(pltpu.get_tpu_info().vmem_capacity_bytes)
    except Exception:
        cap = 64 * _MIB                                  # conservative (v7x-sized) fallback
    vmem_limit = max(32 * _MIB, cap - 16 * _MIB)         # headroom for Mosaic scratch / semaphores
    tile_budget = max(16 * _MIB, vmem_limit // 2)        # ~24 MiB on v7x, ~56 MiB on v5e/v6e
    return vmem_limit, tile_budget


def _plan_tiling(n, d, vmem_budget_bytes):
    """Pick (n_pad, row_tile).

    Row tile is chosen from the VMEM budget (not from divisibility); n_pad is then padded
    up to a multiple of the tile, bounded to <=12.5% inflation so the dense [N,N,D] edge
    tensor does not grow quadratically.  Always >=2 grid steps (megacore parts).
    """
    n_base = max(8, _round_up(n, 8))
    if n_base >= 128:
        n_base = _round_up(n_base, 128)                  # lane-dense mask/alpha, MXU-aligned K
    max_infl = max(0, n_base // 8)
    for tile in _TILE_CANDIDATES:
        n_pad = _round_up(n_base, tile)
        if n_pad - n_base > max_infl:
            continue
        if n_pad // tile < 2:                            # both TensorCores need work
            continue
        # working set: 2x double-buffered e_raw block + ~3 [T,Np,D] temporaries,
        # masks/logits, double-buffered resident xl, we/att/bias.
        ws = (5 * tile * n_pad * d + 4 * tile * n_pad
              + 2 * n_pad * d + 2 * d * d + 4 * d) * 4
        if ws <= vmem_budget_bytes:
            return n_pad, tile
    return max(16, _round_up(n_base, 8)), 8              # fallback: smallest tile, >=2 steps


# ---------------------------------------------------------------------------
# Attention + aggregation kernel, row-tiled over target nodes.
# Inputs per grid step i (rows i*T .. i*T+T-1 are the target nodes):
#   xl   [Np, D]    lin_l(x) for ALL source nodes (grid-invariant, VMEM resident)
#   xr   [T,  D]    lin_r(x)+bias for this tile's targets
#   eraw [T, Np, D] RAW dense edge attrs (0 off-edge, 'mean' self-loop attr on diagonal)
#   mask [T, Np]    1.0 for edges j->i and self loops
#   we   [D, D]     lin_edge weight (bias-free)
# ---------------------------------------------------------------------------
def gat_attn_kernel(xl_ref, xr_ref, eraw_ref, mask_ref, we_ref, att_ref, b_ref, xin_ref,
                    o_ref, *, apply_relu, add_residual):
    t, n_pad, d = eraw_ref.shape
    xl = xl_ref[...]
    xr = xr_ref[...]
    mask = mask_ref[...]

    # lin_edge in-kernel on the MXU: off-edge rows are exactly zero and lin_edge has no
    # bias, so projecting the dense block keeps them zero.
    ep = jnp.dot(eraw_ref[...].reshape(t * n_pad, d), we_ref[...],
                 preferred_element_type=jnp.float32).reshape(t, n_pad, d)

    # message: s_ij = leaky_relu(lin_r(x_i) + lin_l(x_j) + lin_edge(e_ij))
    s = xr[:, None, :] + xl[None, :, :] + ep
    s = jnp.where(s >= 0, s, NEG_SLOPE * s)

    # attention logits + masked softmax over sources j (incl. self loop).
    # Single masking: exp(-1e30 - m) underflows to exactly 0, no extra `* mask` needed.
    logit = jnp.sum(s * att_ref[...], axis=-1)           # [T, Np]  lane reduce -> XLU
    logit = jnp.where(mask > 0, logit, jnp.float32(-1e30))
    m = jnp.max(logit, axis=-1, keepdims=True)
    p = jnp.exp(logit - m)
    denom = jnp.sum(p, axis=-1, keepdims=True)
    alpha = p * pl.reciprocal(denom, approx=True)        # EUP reciprocal (otherwise idle slot)

    # aggregate 'add': out_i = sum_j alpha_ij * (lin_l(x_j) + lin_edge(e_ij))
    out = jnp.dot(alpha, xl, preferred_element_type=jnp.float32)   # bulk MACs on the MXU
    out = out + jnp.sum(alpha[:, :, None] * ep, axis=1)            # edge term on VPU/XLU
    out = out + b_ref[...]                                         # conv bias

    if apply_relu:            # encoder activation (all but the last conv)
        out = jnp.maximum(out, 0.0)
    if add_residual:          # short_cut (after activation, like the reference)
        out = out + xin_ref[...]
    o_ref[...] = out


def gat_attn_layer(xl, xr, e_raw, mask, we, att, bias, x_in, *,
                   apply_relu, add_residual, tile, vmem_limit_bytes):
    n_pad, d = xl.shape
    grid = (n_pad // tile,)
    kern = functools.partial(gat_attn_kernel,
                             apply_relu=apply_relu, add_residual=add_residual)
    return pl.pallas_call(
        kern,
        out_shape=jax.ShapeDtypeStruct((n_pad, d), jnp.float32),
        grid=grid,
        in_specs=[
            pl.BlockSpec((n_pad, d), lambda i: (0, 0)),            # xl: full, grid-invariant
            pl.BlockSpec((tile, d), lambda i: (i, 0)),             # xr: target-row tile
            pl.BlockSpec((tile, n_pad, d), lambda i: (i, 0, 0)),   # raw dense edge block (dominant DMA)
            pl.BlockSpec((tile, n_pad), lambda i: (i, 0)),         # adjacency+self-loop mask
            pl.BlockSpec((d, d), lambda i: (0, 0)),                # lin_edge weight
            pl.BlockSpec((1, d), lambda i: (0, 0)),                # att
            pl.BlockSpec((1, d), lambda i: (0, 0)),                # conv bias
            pl.BlockSpec((tile, d), lambda i: (i, 0)),             # layer input (residual)
        ],
        out_specs=pl.BlockSpec((tile, d), lambda i: (i, 0)),
        compiler_params=pltpu.CompilerParams(
            dimension_semantics=("parallel",),                     # split rows across cores
            vmem_limit_bytes=vmem_limit_bytes,
        ),
    )(xl, xr, e_raw, mask, we, att, bias, x_in)


# ---------------------------------------------------------------------------
# Encoder wrapper (graph densification / tiny projections in plain JAX).
# ---------------------------------------------------------------------------
@functools.partial(jax.jit, static_argnames=("num_convs", "short_cut"))
def gat_encoder_2(z, edge_index, edge_attr, layer_params, *, num_convs=3, short_cut=True):
    # embed_node=False path: node_attr = z directly.
    # TODO(synk): node_emb MLP (only used when embed_node=True) is not implemented here.
    n, d = z.shape
    src, dst = edge_index[0], edge_index[1]
    f32 = jnp.float32

    vmem_limit_bytes, tile_budget = _vmem_limits()
    n_pad, tile = _plan_tiling(n, d, tile_budget)

    x_pad = jnp.pad(z.astype(f32), ((0, n_pad - n), (0, 0)))

    # --- sparse -> dense graph glue, done ONCE before the conv loop -----------------------
    # (dynamic scatter has no clean Pallas TPU primitive; inputs assumed self-loop free,
    #  the reference runs remove_self_loops first.)
    eye = jnp.eye(n_pad, dtype=f32)
    adj = jnp.zeros((n_pad, n_pad), f32).at[dst, src].set(1.0) * (1.0 - eye)
    mask = adj + eye                                     # neighbors + self loop per target row
    # add_self_loops(fill_value='mean'): self-loop attr = scatter-mean of incoming edge attrs
    cnt = jnp.zeros((n,), f32).at[dst].add(1.0)
    loop_attr = (jnp.zeros((n, d), f32).at[dst].add(edge_attr.astype(f32))
                 / jnp.maximum(cnt, 1.0)[:, None])       # 0 for zero-in-degree nodes
    diag = jnp.arange(n)
    e_dense = jnp.zeros((n_pad, n_pad, d), f32).at[dst, src].set(edge_attr.astype(f32))
    e_dense = e_dense.at[diag, diag].set(loop_attr)      # RAW attrs; lin_edge applied in-kernel

    conv_input = x_pad
    hidden = conv_input
    for conv_id in range(num_convs):
        p = layer_params[conv_id]

        # node projections: tiny [N,D]@[D,D] matmuls -> plain XLA (per review)
        xl = conv_input @ p['wl']                        # lin_l (no bias)
        xr = conv_input @ p['wr'] + p['br']              # lin_r (+ bias)

        # attention + aggregation + in-kernel lin_edge (Pallas), row-tiled over targets
        hidden = gat_attn_layer(
            xl, xr, e_dense, mask, p['we'], p['att'], p['bias'], conv_input,
            apply_relu=(conv_id < num_convs - 1),
            add_residual=short_cut,
            tile=tile,
            vmem_limit_bytes=vmem_limit_bytes,
        )
        conv_input = hidden

    return hidden[:n]   # concat_hidden=False -> last hidden; drop padded rows


def init_layer_params(key, d):
    ks = jax.random.split(key, 5)
    glorot = (2.0 / (d + d)) ** 0.5
    return {
        'wl':  jax.random.normal(ks[0], (d, d), jnp.float32) * glorot,   # lin_l.weight (no bias)
        'wr':  jax.random.normal(ks[1], (d, d), jnp.float32) * glorot,   # lin_r.weight
        'br':  jax.random.normal(ks[2], (1, d), jnp.float32) * 0.05,     # lin_r.bias
        'we':  jax.random.normal(ks[3], (d, d), jnp.float32) * glorot,   # lin_edge.weight (no bias)
        'att': jax.random.normal(ks[4], (1, d), jnp.float32) * glorot,
        'bias': jnp.zeros((1, d), jnp.float32),                          # zeros() per reset_parameters
    }


if __name__ == "__main__":
    N = 21            # number of graph nodes
    D = 32            # hidden_dim (= node feature dim = edge_dim)
    NUM_CONVS = 3

    key = jax.random.PRNGKey(0)
    k_z, k_e, k_p = jax.random.split(key, 3)

    # node features z: [N, D]
    z = jax.random.normal(k_z, (N, D), jnp.float32)

    # simple directed graph: edges (i+1)%N -> i and (i+5)%N -> i (no self loops, no duplicates)
    dst = jnp.concatenate([jnp.arange(N), jnp.arange(N)])
    src = jnp.concatenate([(jnp.arange(N) + 1) % N, (jnp.arange(N) + 5) % N])
    edge_index = jnp.stack([src, dst]).astype(jnp.int32)           # [2, E]
    edge_attr = jax.random.normal(k_e, (src.shape[0], D), jnp.float32)

    layer_params = [init_layer_params(k, D) for k in jax.random.split(k_p, NUM_CONVS)]

    out = gat_encoder_2(z, edge_index, edge_attr, layer_params,
                        num_convs=NUM_CONVS, short_cut=True)
    out = jax.block_until_ready(out)
    assert out.shape == (N, D) and bool(jnp.all(jnp.isfinite(out)))
    print("KERNEL_OK")
</pallas_src>

<mosaic_0001>
module attributes {stable_mosaic.version = 11 : i64} {
  func.func @gat_attn_kernel(%arg0: i32, %arg1: memref<24x32xf32, #tpu.memory_space<vmem>>, %arg2: memref<8x32xf32, #tpu.memory_space<vmem>>, %arg3: memref<8x24x32xf32, #tpu.memory_space<vmem>>, %arg4: memref<8x24xf32, #tpu.memory_space<vmem>>, %arg5: memref<32x32xf32, #tpu.memory_space<vmem>>, %arg6: memref<1x32xf32, #tpu.memory_space<vmem>>, %arg7: memref<1x32xf32, #tpu.memory_space<vmem>>, %arg8: memref<8x32xf32, #tpu.memory_space<vmem>>, %arg9: memref<8x32xf32, #tpu.memory_space<vmem>>) attributes {dimension_semantics = [#tpu.dimension_semantics<parallel>], iteration_bounds = array<i64: 3>, scalar_prefetch = 0 : i64, scratch_operands = 0 : i64, tpu.core_type = #tpu.core_type<tc>, window_params = [{pipeline_mode = #tpu.pipeline_mode<synchronous>, transform_indices = @transform_0, window_bounds = array<i64: 24, 32>}, {transform_indices = @transform_1, window_bounds = array<i64: 8, 32>}, {transform_indices = @transform_2, window_bounds = array<i64: 8, 24, 32>}, {transform_indices = @transform_3, window_bounds = array<i64: 8, 24>}, {pipeline_mode = #tpu.pipeline_mode<synchronous>, transform_indices = @transform_4, window_bounds = array<i64: 32, 32>}, {pipeline_mode = #tpu.pipeline_mode<synchronous>, transform_indices = @transform_5, window_bounds = array<i64: 1, 32>}, {pipeline_mode = #tpu.pipeline_mode<synchronous>, transform_indices = @transform_6, window_bounds = array<i64: 1, 32>}, {transform_indices = @transform_7, window_bounds = array<i64: 8, 32>}, {transform_indices = @transform_8, window_bounds = array<i64: 8, 32>}]} {
    %c0 = arith.constant 0 : index
    %c0_0 = arith.constant 0 : index
    %0 = vector.load %arg1[%c0, %c0_0] : memref<24x32xf32, #tpu.memory_space<vmem>>, vector<24x32xf32>
    %c0_1 = arith.constant 0 : index
    %c0_2 = arith.constant 0 : index
    %1 = vector.load %arg2[%c0_1, %c0_2] : memref<8x32xf32, #tpu.memory_space<vmem>>, vector<8x32xf32>
    %c0_3 = arith.constant 0 : index
    %c0_4 = arith.constant 0 : index
    %2 = vector.load %arg4[%c0_3, %c0_4] : memref<8x24xf32, #tpu.memory_space<vmem>>, vector<8x24xf32>
    %c0_5 = arith.constant 0 : index
    %c0_6 = arith.constant 0 : index
    %c0_7 = arith.constant 0 : index
    %3 = vector.load %arg3[%c0_5, %c0_6, %c0_7] : memref<8x24x32xf32, #tpu.memory_space<vmem>>, vector<8x24x32xf32>
    %4 = vector.shape_cast %3 : vector<8x24x32xf32> to vector<192x32xf32>
    %c0_8 = arith.constant 0 : index
    %c0_9 = arith.constant 0 : index
    %5 = vector.load %arg5[%c0_8, %c0_9] : memref<32x32xf32, #tpu.memory_space<vmem>>, vector<32x32xf32>
    %cst = arith.constant dense<0.000000e+00> : vector<192x32xf32>
    %6 = tpu.matmul %4, %5, %cst {dimension_numbers = #tpu.dot_dimension_numbers<[1], [0], [0], [1], [0, 0, 1, 1], [], []>} : vector<192x32xf32>, vector<32x32xf32>, vector<192x32xf32> -> vector<192x32xf32>
    %7 = vector.shape_cast %6 : vector<192x32xf32> to vector<8x24x32xf32>
    %8 = vector.shape_cast %1 : vector<8x32xf32> to vector<8x1x32xf32>
    %9 = vector.shape_cast %0 : vector<24x32xf32> to vector<1x24x32xf32>
    %10 = vector.broadcast %8 : vector<8x1x32xf32> to vector<8x24x32xf32>
    %11 = vector.broadcast %9 : vector<1x24x32xf32> to vector<8x24x32xf32>
    %12 = arith.addf %10, %11 : vector<8x24x32xf32>
    %13 = arith.addf %12, %7 : vector<8x24x32xf32>
    %cst_10 = arith.constant 0.000000e+00 : f32
    %14 = vector.broadcast %cst_10 : f32 to vector<8x24x32xf32>
    %15 = arith.cmpf oge, %13, %14 : vector<8x24x32xf32>
    %cst_11 = arith.constant 2.000000e-01 : f32
    %16 = vector.broadcast %cst_11 : f32 to vector<8x24x32xf32>
    %17 = arith.mulf %16, %13 : vector<8x24x32xf32>
    %18 = arith.select %15, %13, %17 : vector<8x24x32xi1>, vector<8x24x32xf32>
    %c0_12 = arith.constant 0 : index
    %c0_13 = arith.constant 0 : index
    %19 = vector.load %arg6[%c0_12, %c0_13] : memref<1x32xf32, #tpu.memory_space<vmem>>, vector<1x32xf32>
    %20 = vector.shape_cast %19 : vector<1x32xf32> to vector<1x1x32xf32>
    %21 = vector.broadcast %20 : vector<1x1x32xf32> to vector<8x24x32xf32>
    %22 = arith.mulf %18, %21 : vector<8x24x32xf32>
    %cst_14 = arith.constant dense<0.000000e+00> : vector<8x24xf32>
    %23 = vector.multi_reduction <add>, %22, %cst_14 [2] : vector<8x24x32xf32> to vector<8x24xf32>
    %cst_15 = arith.constant 0.000000e+00 : f32
    %24 = vector.broadcast %cst_15 : f32 to vector<8x24xf32>
    %25 = arith.cmpf ogt, %2, %24 : vector<8x24xf32>
    %cst_16 = arith.constant -1.000000e+30 : f32
    %26 = vector.broadcast %cst_16 : f32 to vector<8x24xf32>
    %27 = arith.select %25, %23, %26 : vector<8x24xi1>, vector<8x24xf32>
    %cst_17 = arith.constant dense<0xFF800000> : vector<8xf32>
    %28 = vector.multi_reduction <maximumf>, %27, %cst_17 [1] : vector<8x24xf32> to vector<8xf32>
    %29 = vector.shape_cast %28 : vector<8xf32> to vector<8x1xf32>
    %30 = vector.broadcast %29 : vector<8x1xf32> to vector<8x24xf32>
    %31 = arith.subf %27, %30 : vector<8x24xf32>
    %32 = math.exp %31 : vector<8x24xf32>
    %cst_18 = arith.constant dense<0.000000e+00> : vector<8xf32>
    %33 = vector.multi_reduction <add>, %32, %cst_18 [1] : vector<8x24xf32> to vector<8xf32>
    %34 = vector.shape_cast %33 : vector<8xf32> to vector<8x1xf32>
    %35 = tpu.reciprocal %34 {approx = true} : vector<8x1xf32> -> vector<8x1xf32>
    %36 = vector.broadcast %35 : vector<8x1xf32> to vector<8x24xf32>
    %37 = arith.mulf %32, %36 : vector<8x24xf32>
    %cst_19 = arith.constant dense<0.000000e+00> : vector<8x32xf32>
    %38 = tpu.matmul %37, %0, %cst_19 {dimension_numbers = #tpu.dot_dimension_numbers<[1], [0], [0], [1], [0, 0, 1, 1], [], []>} : vector<8x24xf32>, vector<24x32xf32>, vector<8x32xf32> -> vector<8x32xf32>
    %39 = vector.shape_cast %37 : vector<8x24xf32> to vector<8x24x1xf32>
    %40 = vector.broadcast %39 : vector<8x24x1xf32> to vector<8x24x32xf32>
    %41 = arith.mulf %40, %7 : vector<8x24x32xf32>
    %cst_20 = arith.constant dense<0.000000e+00> : vector<8x32xf32>
    %42 = vector.multi_reduction <add>, %41, %cst_20 [1] : vector<8x24x32xf32> to vector<8x32xf32>
    %43 = arith.addf %38, %42 : vector<8x32xf32>
    %c0_21 = arith.constant 0 : index
    %c0_22 = arith.constant 0 : index
    %44 = vector.load %arg7[%c0_21, %c0_22] : memref<1x32xf32, #tpu.memory_space<vmem>>, vector<1x32xf32>
    %45 = vector.broadcast %44 : vector<1x32xf32> to vector<8x32xf32>
    %46 = arith.addf %43, %45 : vector<8x32xf32>
    %cst_23 = arith.constant 0.000000e+00 : f32
    %47 = vector.broadcast %cst_23 : f32 to vector<8x32xf32>
    %48 = arith.maximumf %46, %47 : vector<8x32xf32>
    %c0_24 = arith.constant 0 : index
    %c0_25 = arith.constant 0 : index
    %49 = vector.load %arg8[%c0_24, %c0_25] : memref<8x32xf32, #tpu.memory_space<vmem>>, vector<8x32xf32>
    %50 = arith.addf %48, %49 : vector<8x32xf32>
    %c0_26 = arith.constant 0 : index
    %c0_27 = arith.constant 0 : index
    %51 = vector.load %arg9[%c0_26, %c0_27] : memref<8x32xf32, #tpu.memory_space<vmem>>, vector<8x32xf32>
    tpu.vector_store %arg9[%c0_26, %c0_27], %50 {strides = array<i32>} : memref<8x32xf32, #tpu.memory_space<vmem>>, vector<8x32xf32>,
    return
  }
  func.func @transform_0(%arg0: i32) -> (i32, i32) {
    %c0_i32 = arith.constant 0 : i32
    %c0_i32_0 = arith.constant 0 : i32
    %c0_i32_1 = arith.constant 0 : i32
    return %c0_i32, %c0_i32_0 : i32, i32
  }
  func.func @transform_1(%arg0: i32) -> (i32, i32) {
    %c0_i32 = arith.constant 0 : i32
    %c0_i32_0 = arith.constant 0 : i32
    return %arg0, %c0_i32 : i32, i32
  }
  func.func @transform_2(%arg0: i32) -> (i32, i32, i32) {
    %c0_i32 = arith.constant 0 : i32
    %c0_i32_0 = arith.constant 0 : i32
    %c0_i32_1 = arith.constant 0 : i32
    return %arg0, %c0_i32, %c0_i32_0 : i32, i32, i32
  }
  func.func @transform_3(%arg0: i32) -> (i32, i32) {
    %c0_i32 = arith.constant 0 : i32
    %c0_i32_0 = arith.constant 0 : i32
    return %arg0, %c0_i32 : i32, i32
  }
  func.func @transform_4(%arg0: i32) -> (i32, i32) {
    %c0_i32 = arith.constant 0 : i32
    %c0_i32_0 = arith.constant 0 : i32
    %c0_i32_1 = arith.constant 0 : i32
    return %c0_i32, %c0_i32_0 : i32, i32
  }
  func.func @transform_5(%arg0: i32) -> (i32, i32) {
    %c0_i32 = arith.constant 0 : i32
    %c0_i32_0 = arith.constant 0 : i32
    %c0_i32_1 = arith.constant 0 : i32
    return %c0_i32, %c0_i32_0 : i32, i32
  }
  func.func @transform_6(%arg0: i32) -> (i32, i32) {
    %c0_i32 = arith.constant 0 : i32
    %c0_i32_0 = arith.constant 0 : i32
    %c0_i32_1 = arith.constant 0 : i32
    return %c0_i32, %c0_i32_0 : i32, i32
  }
  func.func @transform_7(%arg0: i32) -> (i32, i32) {
    %c0_i32 = arith.constant 0 : i32
    %c0_i32_0 = arith.constant 0 : i32
    return %arg0, %c0_i32 : i32, i32
  }
  func.func @transform_8(%arg0: i32) -> (i32, i32) {
    %c0_i32 = arith.constant 0 : i32
    %c0_i32_0 = arith.constant 0 : i32
    return %arg0, %c0_i32 : i32, i32
  }
}

module attributes {stable_mosaic.version = 11 : i64} {
  func.func @gat_attn_kernel(%arg0: i32, %arg1: memref<24x32xf32, #tpu.memory_space<vmem>>, %arg2: memref<8x32xf32, #tpu.memory_space<vmem>>, %arg3: memref<8x24x32xf32, #tpu.memory_space<vmem>>, %arg4: memref<8x24xf32, #tpu.memory_space<vmem>>, %arg5: memref<32x32xf32, #tpu.memory_space<vmem>>, %arg6: memref<1x32xf32, #tpu.memory_space<vmem>>, %arg7: memref<1x32xf32, #tpu.memory_space<vmem>>, %arg8: memref<8x32xf32, #tpu.memory_space<vmem>>, %arg9: memref<8x32xf32, #tpu.memory_space<vmem>>) attributes {dimension_semantics = [#tpu.dimension_semantics<parallel>], iteration_bounds = array<i64: 3>, scalar_prefetch = 0 : i64, scratch_operands = 0 : i64, tpu.core_type = #tpu.core_type<tc>, window_params = [{pipeline_mode = #tpu.pipeline_mode<synchronous>, transform_indices = @transform_0, window_bounds = array<i64: 24, 32>}, {transform_indices = @transform_1, window_bounds = array<i64: 8, 32>}, {transform_indices = @transform_2, window_bounds = array<i64: 8, 24, 32>}, {transform_indices = @transform_3, window_bounds = array<i64: 8, 24>}, {pipeline_mode = #tpu.pipeline_mode<synchronous>, transform_indices = @transform_4, window_bounds = array<i64: 32, 32>}, {pipeline_mode = #tpu.pipeline_mode<synchronous>, transform_indices = @transform_5, window_bounds = array<i64: 1, 32>}, {pipeline_mode = #tpu.pipeline_mode<synchronous>, transform_indices = @transform_6, window_bounds = array<i64: 1, 32>}, {transform_indices = @transform_7, window_bounds = array<i64: 8, 32>}, {transform_indices = @transform_8, window_bounds = array<i64: 8, 32>}]} {
    %c0 = arith.constant 0 : index
    %c0_0 = arith.constant 0 : index
    %0 = vector.load %arg1[%c0, %c0_0] : memref<24x32xf32, #tpu.memory_space<vmem>>, vector<24x32xf32>
    %c0_1 = arith.constant 0 : index
    %c0_2 = arith.constant 0 : index
    %1 = vector.load %arg2[%c0_1, %c0_2] : memref<8x32xf32, #tpu.memory_space<vmem>>, vector<8x32xf32>
    %c0_3 = arith.constant 0 : index
    %c0_4 = arith.constant 0 : index
    %2 = vector.load %arg4[%c0_3, %c0_4] : memref<8x24xf32, #tpu.memory_space<vmem>>, vector<8x24xf32>
    %c0_5 = arith.constant 0 : index
    %c0_6 = arith.constant 0 : index
    %c0_7 = arith.constant 0 : index
    %3 = vector.load %arg3[%c0_5, %c0_6, %c0_7] : memref<8x24x32xf32, #tpu.memory_space<vmem>>, vector<8x24x32xf32>
    %4 = vector.shape_cast %3 : vector<8x24x32xf32> to vector<192x32xf32>
    %c0_8 = arith.constant 0 : index
    %c0_9 = arith.constant 0 : index
    %5 = vector.load %arg5[%c0_8, %c0_9] : memref<32x32xf32, #tpu.memory_space<vmem>>, vector<32x32xf32>
    %cst = arith.constant dense<0.000000e+00> : vector<192x32xf32>
    %6 = tpu.matmul %4, %5, %cst {dimension_numbers = #tpu.dot_dimension_numbers<[1], [0], [0], [1], [0, 0, 1, 1], [], []>} : vector<192x32xf32>, vector<32x32xf32>, vector<192x32xf32> -> vector<192x32xf32>
    %7 = vector.shape_cast %6 : vector<192x32xf32> to vector<8x24x32xf32>
    %8 = vector.shape_cast %1 : vector<8x32xf32> to vector<8x1x32xf32>
    %9 = vector.shape_cast %0 : vector<24x32xf32> to vector<1x24x32xf32>
    %10 = vector.broadcast %8 : vector<8x1x32xf32> to vector<8x24x32xf32>
    %11 = vector.broadcast %9 : vector<1x24x32xf32> to vector<8x24x32xf32>
    %12 = arith.addf %10, %11 : vector<8x24x32xf32>
    %13 = arith.addf %12, %7 : vector<8x24x32xf32>
    %cst_10 = arith.constant 0.000000e+00 : f32
    %14 = vector.broadcast %cst_10 : f32 to vector<8x24x32xf32>
    %15 = arith.cmpf oge, %13, %14 : vector<8x24x32xf32>
    %cst_11 = arith.constant 2.000000e-01 : f32
    %16 = vector.broadcast %cst_11 : f32 to vector<8x24x32xf32>
    %17 = arith.mulf %16, %13 : vector<8x24x32xf32>
    %18 = arith.select %15, %13, %17 : vector<8x24x32xi1>, vector<8x24x32xf32>
    %c0_12 = arith.constant 0 : index
    %c0_13 = arith.constant 0 : index
    %19 = vector.load %arg6[%c0_12, %c0_13] : memref<1x32xf32, #tpu.memory_space<vmem>>, vector<1x32xf32>
    %20 = vector.shape_cast %19 : vector<1x32xf32> to vector<1x1x32xf32>
    %21 = vector.broadcast %20 : vector<1x1x32xf32> to vector<8x24x32xf32>
    %22 = arith.mulf %18, %21 : vector<8x24x32xf32>
    %cst_14 = arith.constant dense<0.000000e+00> : vector<8x24xf32>
    %23 = vector.multi_reduction <add>, %22, %cst_14 [2] : vector<8x24x32xf32> to vector<8x24xf32>
    %cst_15 = arith.constant 0.000000e+00 : f32
    %24 = vector.broadcast %cst_15 : f32 to vector<8x24xf32>
    %25 = arith.cmpf ogt, %2, %24 : vector<8x24xf32>
    %cst_16 = arith.constant -1.000000e+30 : f32
    %26 = vector.broadcast %cst_16 : f32 to vector<8x24xf32>
    %27 = arith.select %25, %23, %26 : vector<8x24xi1>, vector<8x24xf32>
    %cst_17 = arith.constant dense<0xFF800000> : vector<8xf32>
    %28 = vector.multi_reduction <maximumf>, %27, %cst_17 [1] : vector<8x24xf32> to vector<8xf32>
    %29 = vector.shape_cast %28 : vector<8xf32> to vector<8x1xf32>
    %30 = vector.broadcast %29 : vector<8x1xf32> to vector<8x24xf32>
    %31 = arith.subf %27, %30 : vector<8x24xf32>
    %32 = math.exp %31 : vector<8x24xf32>
    %cst_18 = arith.constant dense<0.000000e+00> : vector<8xf32>
    %33 = vector.multi_reduction <add>, %32, %cst_18 [1] : vector<8x24xf32> to vector<8xf32>
    %34 = vector.shape_cast %33 : vector<8xf32> to vector<8x1xf32>
    %35 = tpu.reciprocal %34 {approx = true} : vector<8x1xf32> -> vector<8x1xf32>
    %36 = vector.broadcast %35 : vector<8x1xf32> to vector<8x24xf32>
    %37 = arith.mulf %32, %36 : vector<8x24xf32>
    %cst_19 = arith.constant dense<0.000000e+00> : vector<8x32xf32>
    %38 = tpu.matmul %37, %0, %cst_19 {dimension_numbers = #tpu.dot_dimension_numbers<[1], [0], [0], [1], [0, 0, 1, 1], [], []>} : vector<8x24xf32>, vector<24x32xf32>, vector<8x32xf32> -> vector<8x32xf32>
    %39 = vector.shape_cast %37 : vector<8x24xf32> to vector<8x24x1xf32>
    %40 = vector.broadcast %39 : vector<8x24x1xf32> to vector<8x24x32xf32>
    %41 = arith.mulf %40, %7 : vector<8x24x32xf32>
    %cst_20 = arith.constant dense<0.000000e+00> : vector<8x32xf32>
    %42 = vector.multi_reduction <add>, %41, %cst_20 [1] : vector<8x24x32xf32> to vector<8x32xf32>
    %43 = arith.addf %38, %42 : vector<8x32xf32>
    %c0_21 = arith.constant 0 : index
    %c0_22 = arith.constant 0 : index
    %44 = vector.load %arg7[%c0_21, %c0_22] : memref<1x32xf32, #tpu.memory_space<vmem>>, vector<1x32xf32>
    %45 = vector.broadcast %44 : vector<1x32xf32> to vector<8x32xf32>
    %46 = arith.addf %43, %45 : vector<8x32xf32>
    %c0_23 = arith.constant 0 : index
    %c0_24 = arith.constant 0 : index
    %47 = vector.load %arg8[%c0_23, %c0_24] : memref<8x32xf32, #tpu.memory_space<vmem>>, vector<8x32xf32>
    %48 = arith.addf %46, %47 : vector<8x32xf32>
    %c0_25 = arith.constant 0 : index
    %c0_26 = arith.constant 0 : index
    %49 = vector.load %arg9[%c0_25, %c0_26] : memref<8x32xf32, #tpu.memory_space<vmem>>, vector<8x32xf32>
    tpu.vector_store %arg9[%c0_25, %c0_26], %48 {strides = array<i32>} : memref<8x32xf32, #tpu.memory_space<vmem>>, vector<8x32xf32>,
    return
  }
  func.func @transform_0(%arg0: i32) -> (i32, i32) {
    %c0_i32 = arith.constant 0 : i32
    %c0_i32_0 = arith.constant 0 : i32
    %c0_i32_1 = arith.constant 0 : i32
    return %c0_i32, %c0_i32_0 : i32, i32
  }
  func.func @transform_1(%arg0: i32) -> (i32, i32) {
    %c0_i32 = arith.constant 0 : i32
    %c0_i32_0 = arith.constant 0 : i32
    return %arg0, %c0_i32 : i32, i32
  }
  func.func @transform_2(%arg0: i32) -> (i32, i32, i32) {
    %c0_i32 = arith.constant 0 : i32
    %c0_i32_0 = arith.constant 0 : i32
    %c0_i32_1 = arith.constant 0 : i32
    return %arg0, %c0_i32, %c0_i32_0 : i32, i32, i32
  }
  func.func @transform_3(%arg0: i32) -> (i32, i32) {
    %c0_i32 = arith.constant 0 : i32
    %c0_i32_0 = arith.constant 0 : i32
    return %arg0, %c0_i32 : i32, i32
  }
  func.func @transform_4(%arg0: i32) -> (i32, i32) {
    %c0_i32 = arith.constant 0 : i32
    %c0_i32_0 = arith.constant 0 : i32
    %c0_i32_1 = arith.constant 0 : i32
    return %c0_i32, %c0_i32_0 : i32, i32
  }
  func.func @transform_5(%arg0: i32) -> (i32, i32) {
    %c0_i32 = arith.constant 0 : i32
    %c0_i32_0 = arith.constant 0 : i32
    %c0_i32_1 = arith.constant 0 : i32
    return %c0_i32, %c0_i32_0 : i32, i32
  }
  func.func @transform_6(%arg0: i32) -> (i32, i32) {
    %c0_i32 = arith.constant 0 : i32
    %c0_i32_0 = arith.constant 0 : i32
    %c0_i32_1 = arith.constant 0 : i32
    return %c0_i32, %c0_i32_0 : i32, i32
  }
  func.func @transform_7(%arg0: i32) -> (i32, i32) {
    %c0_i32 = arith.constant 0 : i32
    %c0_i32_0 = arith.constant 0 : i32
    return %arg0, %c0_i32 : i32, i32
  }
  func.func @transform_8(%arg0: i32) -> (i32, i32) {
    %c0_i32 = arith.constant 0 : i32
    %c0_i32_0 = arith.constant 0 : i32
    return %arg0, %c0_i32 : i32, i32
  }
}

</mosaic_0001>

<bundles_post_ra>
// kernel: gat_encoder_2.3
= control target key start
LH: loop header
LB: loop body
LE: loop exit
PB: predicated region body
PF: predicated region fallthrough
CT: control target
= control target key end

     0   :  { %s1763_s27 = smov 0   ;;  %s2219_s0 = inlined_call_operand.vmem [shape: f32[24,32], index: 0, kind: input, shape index: {}]   ;;  %s2220_s1 = inlined_call_operand.vmem [shape: f32[24,32], index: 1, kind: input, shape index: {}]   ;;  %s2221_s2 = inlined_call_operand.vmem [shape: f32[24,24,32], index: 2, kind: input, shape index: {}]   ;;  %s2222_s3 = inlined_call_operand.vmem [shape: f32[24,24], index: 3, kind: input, shape index: {}]   ;;  %s2223_s4 = inlined_call_operand.vmem [shape: f32[32,32], index: 4, kind: input, shape index: {}]   ;;  %s2224_s5 = inlined_call_operand.vmem [shape: f32[1,32], index: 5, kind: input, shape index: {}]   ;;  %s2225_s6 = inlined_call_operand.vmem [shape: f32[1,32], index: 6, kind: input, shape index: {}]   ;;  %s2226_s7 = inlined_call_operand.vmem [shape: f32[24,32], index: 7, kind: input, shape index: {}]   ;;  %s2227_s8 = inlined_call_operand.vmem [shape: f32[24,32], index: 8, kind: output, shape index: {}]  }
   0x1 LB: > { %s1769_s28 = sadd.s32 4294967295, %s1713_s27   ;;  %p1561_p0 = scmp.ge.s32.totalorder %s1713_s27, 1  ;;  %s1713_s27 = sphi %s1763_s27, %s18_s27  }
   0x2   : > { %p291_p1 = scmp.lt.s32.totalorder %s1713_s27, 4 }
   0x4   : > { %p292_p2 = pnand %p1561_p0, %p291_p1 }
   0x5   : > { %s1563_s11 = sshll.u32 (!%p292_p2), %s1769_s28, 3  ;;  %p337_p4 = scmp.lt.s32.totalorder (!%p292_p2), %s1769_s28, 2 }
   0x6   : > { %295 = sbr.rel (%p292_p2) target bundleno = 925 (0x39d), region = 52  ;;  %p342_p3 = scmp.lt.s32.totalorder (!%p292_p2), %s1563_s11, 23 }
   0xb   : > { %v392_v0 = vld [vmem:[%s2223_s4 + $0x18] sm:$0xff]  ;;  %v391_v1 = vld [vmem:[%s2223_s4 + $0x10] sm:$0xff]  ;;  %v390_v2 = vld [vmem:[%s2223_s4 + $0x8] sm:$0xff]  ;;  %s2229_s11 = smov (!%p342_p3, %s1563_s11), 23  ;;  %vm393_vm0 = vcmask 261120   ;;  %s2231_s28 = smov (!%p337_p4, %s1769_s28), 2  ;;  %v656_v30 = vlaneseq }
   0xc   : > { %1629 = vmatprep.subr.mxu0 %v392_v0  ;;  %1682 = vmatprep.subr.mxu1 %v392_v0  ;;  %v389_v3 = vld [vmem:[%s2223_s4] sm:$0xff]  ;;  %s1690_s16 = smul.u32 24, %s2229_s11  ;;  %s1841_s20 = sshll.u32 %s2231_s28, 3  ;;  %v1715_v28 = vmov 1966171168   ;;  %v1864_v47 = vld [vmem:[%s2219_s0 + $0x8] sm:$0xff] }
   0xd   : > { %1630 = vmatpush3.msra.mxu0 %v392_v0  ;;  %1686 = vmatpush3.msra.mxu1 %v392_v0  ;;  %v654_v29 = vunpack.c.l.s4 %v1715_v28  ;;  %s340_s23 = scalar_lea.vmem %s2220_s1, %s1841_s20  ;;  %v1848_v32 = vshrl.u32 %v656_v30, 7  ;;  %v1869_v48 = vld [vmem:[%s2219_s0] sm:$0xff]  ;;  %v1877_v50 = vld [vmem:[%s2219_s0 + $0x10] sm:$0xff]  ;;  %s351_s13 = scalar_lea.vmem %s2222_s3, %s1841_s20 }
   0xe   : > { %1631 = vmatprep.subr.mxu0 %v391_v1  ;;  %1683 = vmatprep.subr.mxu1 %v391_v1  ;;  %s1789_s19 = scalar_lea.vmem %s2221_s2, %s1690_s16  ;;  %v363_v33 = vld [vmem:[%s340_s23] sm:$0xff]  ;;  %s355_s18 = scalar_lea.vmem %s2226_s7, %s1841_s20 }
   0xf   : > { %1632 = vmatpush3.msra.mxu0 %v391_v1  ;;  %1687 = vmatpush3.msra.mxu1 %v391_v1  ;;  %v365_v4 = vld [vmem:[%s1789_s19] sm:$0xff]  ;;  %v379_v5 = vld [vmem:[%s1789_s19 + $0x70] sm:$0xff]  ;;  %v366_v6 = vld [vmem:[%s1789_s19 + $0x8] sm:$0xff]  ;;  %v655_v31 = vunpack.c.0.s8 %v654_v29  ;;  %v652_v34 = vcombine.high %v363_v33, %v363_v33  ;;  %v1852_v40 = vsub.s32 0, %v1848_v32  ;;  %s359_s22 = scalar_lea.vmem %s2227_s8, %s1841_s20 }
  0x10   : > { %1633 = vmatprep.subr.mxu0 %v390_v2  ;;  %1684 = vmatprep.subr.mxu1 %v390_v2  ;;  %v380_v7 = vld [vmem:[%s1789_s19 + $0x78] sm:$0xff]  ;;  %v367_v8 = vld [vmem:[%s1789_s19 + $0x10] sm:$0xff]  ;;  %v381_v9 = vld [vmem:[%s1789_s19 + $0x80] sm:$0xff] }
  0x11   : > { %1634 = vmatpush3.msra.mxu0 %v390_v2  ;;  %1688 = vmatpush3.msra.mxu1 %v390_v2  ;;  %v368_v10 = vld [vmem:[%s1789_s19 + $0x18] sm:$0xff]  ;;  %v382_v11 = vld [vmem:[%s1789_s19 + $0x88] sm:$0xff]  ;;  %v369_v12 = vld [vmem:[%s1789_s19 + $0x20] sm:$0xff]  ;;  %v658_v35 = vsub.s32 %v655_v31, %v1848_v32 }
  0x12   : > { %1635 = vmatprep.subr.mxu0 %v389_v3  ;;  %1685 = vmatprep.subr.mxu1 %v389_v3  ;;  %v383_v13 = vld [vmem:[%s1789_s19 + $0x90] sm:$0xff]  ;;  %v370_v14 = vld [vmem:[%s1789_s19 + $0x28] sm:$0xff]  ;;  %v384_v15 = vld [vmem:[%s1789_s19 + $0x98] sm:$0xff] }
  0x13   : > { %1636 = vmatpush3.msra.mxu0 %v389_v3  ;;  %1689 = vmatpush3.msra.mxu1 %v389_v3  ;;  %v371_v16 = vld [vmem:[%s1789_s19 + $0x30] sm:$0xff]  ;;  %v385_v17 = vld [vmem:[%s1789_s19 + $0xa0] sm:$0xff]  ;;  %v372_v18 = vld [vmem:[%s1789_s19 + $0x38] sm:$0xff]  ;;  %v666_v36 = vrot.slane %v652_v34, %v658_v35  ;;  %v659_v37 = vrot.slane %v363_v33, %v658_v35 }
  0x14   : > { %1637 = vmatprep.mubr.msk.f32.mxu0 %vm393_vm0, %v365_v4  ;;  %1658 = vmatprep.mubr.msk.f32.mxu1 %vm393_vm0, %v379_v5  ;;  %v386_v19 = vld [vmem:[%s1789_s19 + $0xa8] sm:$0xff]  ;;  %v373_v20 = vld [vmem:[%s1789_s19 + $0x40] sm:$0xff]  ;;  %v387_v21 = vld [vmem:[%s1789_s19 + $0xb0] sm:$0xff] }
  0x15   : > { %1638 = vmatmul.mubr.msk.f32.vlgmr.msra.gmra.mxu0 %vm393_vm0, %v366_v6  ;;  %1659 = vmatmul.mubr.msk.f32.vlgmr.msra.gmra.mxu1 %vm393_vm0, %v380_v7  ;;  %v374_v22 = vld [vmem:[%s1789_s19 + $0x48] sm:$0xff]  ;;  %v388_v23 = vld [vmem:[%s1789_s19 + $0xb8] sm:$0xff]  ;;  %v375_v24 = vld [vmem:[%s1789_s19 + $0x50] sm:$0xff]  ;;  %v668_v38 = vcombine.high %v666_v36, %v666_v36  ;;  %v675_v39 = vrot.slane %v659_v37, %v658_v35  ;;  %v667_v42 = vcombine.high %v659_v37, %v659_v37 }
  0x16   : > { %1640 = vmatprep.mubr.msk.f32.mxu0 %vm393_vm0, %v367_v8  ;;  %1661 = vmatprep.mubr.msk.f32.mxu1 %vm393_vm0, %v381_v9  ;;  %v376_v25 = vld [vmem:[%s1789_s19 + $0x58] sm:$0xff]  ;;  %v377_v26 = vld [vmem:[%s1789_s19 + $0x60] sm:$0xff]  ;;  %v378_v27 = vld [vmem:[%s1789_s19 + $0x68] sm:$0xff]  ;;  %v682_v43 = vrot.slane %v666_v36, %v658_v35 }
  0x17   : > { %v1854_v41 = vrot.slane %v668_v38, %v658_v35  ;;  %v704_v44 = vrot.slane %v675_v39, %v1852_v40  ;;  %v1859_v46 = vrot.slane %v667_v42, %v658_v35  ;;  %v697_v55 = vcombine.high %v675_v39, %v675_v39 }
  0x18   : > { %v1872_v49 = vrot.slane %v682_v43, %v1852_v40  ;;  %v698_v51 = vcombine.high %v682_v43, %v682_v43 }
  0x19   : > { %1641 = vmatmul.mubr.msk.f32.gmra.mxu0 %vm393_vm0, %v368_v10  ;;  %1662 = vmatmul.mubr.msk.f32.gmra.mxu1 %vm393_vm0, %v382_v11  ;;  %v724_v45 = vrot.slane %v1854_v41, %v1852_v40  ;;  %v742_v52 = vadd.f32 %v704_v44, %v1864_v47  ;;  %v708_v54 = vrot.slane %v1859_v46, %v1852_v40 }
  0x1a   : > { %1643 = vmatprep.mubr.msk.f32.mxu0 %vm393_vm0, %v369_v12  ;;  %1664 = vmatprep.mubr.msk.f32.mxu1 %vm393_vm0, %v383_v13  ;;  %v741_v56 = vadd.f32 %v704_v44, %v1869_v48  ;;  %v755_v57 = vadd.f32 %v1872_v49, %v1877_v50  ;;  %v1891_v60 = vrot.slane %v698_v51, %v1852_v40 }
  0x1b   : > { %v756_v53 = vadd.f32 %v724_v45, %v1869_v48  ;;  %v744_v63 = vadd.f32 %v708_v54, %v1869_v48  ;;  %v758_v0 = vadd.f32 %v724_v45, %v1877_v50  ;;  %v743_v3 = vadd.f32 %v704_v44, %v1877_v50 }
  0x1c   : > { %v757_v4 = vadd.f32 %v724_v45, %v1864_v47  ;;  %v746_v5 = vadd.f32 %v708_v54, %v1877_v50  ;;  %v1905_v6 = vrot.slane %v697_v55, %v1852_v40  ;;  %v745_v13 = vadd.f32 %v708_v54, %v1864_v47 }
  0x1d   : > { %1644 = vmatmul.mubr.msk.f32.gmra.mxu0 %vm393_vm0, %v370_v14  ;;  %1665 = vmatmul.mubr.msk.f32.gmra.mxu1 %vm393_vm0, %v384_v15  ;;  %v760_v14 = vadd.f32 %v1891_v60, %v1864_v47  ;;  %v700_v28 = vcombine.high %v1854_v41, %v1854_v41 }
  0x1e   : > { %1646 = vmatprep.mubr.msk.f32.mxu0 %vm393_vm0, %v371_v16  ;;  %1667 = vmatprep.mubr.msk.f32.mxu1 %vm393_vm0, %v385_v17 }
  0x21   : > { %1647 = vmatmul.mubr.msk.f32.gmra.mxu0 %vm393_vm0, %v372_v18  ;;  %1668 = vmatmul.mubr.msk.f32.gmra.mxu1 %vm393_vm0, %v386_v19  ;;  %v1921_v18 = vld [vmem:[%s2224_s5] ss:$0 sm:$0xff]  ;;  %v759_v19 = vadd.f32 %v1891_v60, %v1869_v48 }
  0x22   : > { %1649 = vmatprep.mubr.msk.f32.mxu0 %vm393_vm0, %v373_v20  ;;  %1670 = vmatprep.mubr.msk.f32.mxu1 %vm393_vm0, %v387_v21 }
  0x25   : > { %1650 = vmatmul.mubr.msk.f32.gmra.mxu0 %vm393_vm0, %v374_v22  ;;  %1671 = vmatmul.mubr.msk.f32.gmra.mxu1 %vm393_vm0, %v388_v23 }
  0x26   : > { %1652 = vmatprep.mubr.msk.f32.mxu0 %vm393_vm0, %v375_v24  ;;  %v748_v24 = vadd.f32 %v1905_v6, %v1864_v47 }
  0x29   : > { %1653 = vmatmul.mubr.msk.f32.gmra.mxu0 %vm393_vm0, %v376_v25 }
  0x2a   : > { %1655 = vmatprep.mubr.msk.f32.mxu0 %vm393_vm0, %v377_v26 }
  0x2d   : > { %1656 = vmatmul.mubr.msk.f32.gmra.mxu0 %vm393_vm0, %v378_v27 }
  0xd5   : > { %v1886_v58 = vpop.f32.mrf.mxu0  ;;  %v1888_v59 = vpop.f32.mrf.mxu1 }
  0xd6   : > { %v766_v61 = vadd.f32 %v1886_v58, %v742_v52  ;;  %v780_v62 = vadd.f32 %v1888_v59, %v756_v53  ;;  %v747_v52 = vadd.f32 %v1905_v6, %v1869_v48  ;;  %v1951_v53 = vrot.slane %v700_v28, %v1852_v40 }
  0xd7   : > { %v1897_v1 = vpop.f32.mrf.mxu0  ;;  %v1899_v2 = vpop.f32.mrf.mxu1 }
  0xd8   : > { %v814_v7 = vmul.f32 0.2, %v766_v61  ;;  %v828_v8 = vmul.f32 0.2, %v780_v62  ;;  %v765_v9 = vadd.f32 %v741_v56, %v1897_v1  ;;  %v779_v10 = vadd.f32 %v755_v57, %v1899_v2 }
  0xd9   : > { %v1909_v11 = vpop.f32.mrf.mxu0  ;;  %v1911_v12 = vpop.f32.mrf.mxu1  ;;  %vm790_vm1 = vcmp.ge.f32.partialorder %v766_v61, 0.0  ;;  %vm804_vm2 = vcmp.ge.f32.partialorder %v780_v62, 0.0 }
  0xda   : > { %v813_v15 = vmul.f32 0.2, %v765_v9  ;;  %v768_v16 = vadd.f32 %v1909_v11, %v744_v63  ;;  %v782_v17 = vadd.f32 %v1911_v12, %v758_v0  ;;  %v838_v22 = vsel %vm790_vm1, %v766_v61, %v814_v7 }
  0xdb   : > { %v1925_v20 = vpop.f32.mrf.mxu0  ;;  %v1927_v21 = vpop.f32.mrf.mxu1  ;;  %v852_v23 = vsel %vm804_vm2, %v780_v62, %v828_v8  ;;  %vm789_vm3 = vcmp.ge.f32.partialorder %v765_v9, 0.0  ;;  %v827_v25 = vmul.f32 0.2, %v779_v10  ;;  %v869_v31 = vmul.f32 %v1921_v18, %v838_v22 }
  0xdc   : > { %v816_v26 = vmul.f32 0.2, %v768_v16  ;;  %v767_v27 = vadd.f32 %v743_v3, %v1925_v20  ;;  %v883_v33 = vmul.f32 %v1921_v18, %v852_v23  ;;  %v837_v35 = vsel %vm789_vm3, %v765_v9, %v813_v15 }
  0xdd   : > { %v1934_v29 = vpop.f32.mrf.mxu0  ;;  %v1938_v34 = vpop.f32.mrf.mxu1  ;;  %vm792_vm4 = vcmp.ge.f32.partialorder %v768_v16, 0.0  ;;  %v830_v36 = vmul.f32 0.2, %v782_v17  ;;  %v781_v37 = vadd.f32 %v757_v4, %v1927_v21  ;;  %vm803_vm5 = vcmp.ge.f32.partialorder %v779_v10, 0.0 }
  0xde   : > { %v770_v38 = vadd.f32 %v1934_v29, %v746_v5  ;;  %v895_v39 = vsel %vm393_vm0, %v869_v31, 0.0  ;;  %v937_v41 = vsel %vm393_vm0, %v883_v33, 0.0  ;;  %v868_v43 = vmul.f32 %v1921_v18, %v837_v35 }
  0xdf   : > { %v1944_v42 = vpop.f32.mrf.mxu0  ;;  %v840_v44 = vsel %vm792_vm4, %v768_v16, %v816_v26  ;;  %v815_v45 = vmul.f32 0.2, %v767_v27  ;;  %896 = vadd.xlane.f32.xlu0 %v895_v39  ;;  %938 = vadd.xlane.f32.xlu1 %v937_v41  ;;  %v784_v55 = vadd.f32 %v1938_v34, %v760_v14  ;;  %v1954_v56 = vpop.f32.mrf.mxu1  ;;  %v851_v57 = vsel %vm803_vm5, %v779_v10, %v827_v25 }
  0xe0   : > { %v871_v51 = vmul.f32 %v1921_v18, %v840_v44  ;;  %v818_v54 = vmul.f32 0.2, %v770_v38  ;;  %vm806_vm6 = vcmp.ge.f32.partialorder %v782_v17, 0.0  ;;  %v829_v62 = vmul.f32 0.2, %v781_v37 }
  0xe1   : > { %v1956_v61 = vpop.f32.mrf.mxu0  ;;  %v854_v0 = vsel %vm806_vm6, %v782_v17, %v830_v36  ;;  %v699_v3 = vcombine.high %v1859_v46, %v1859_v46  ;;  %v892_v4 = vsel %vm393_vm0, %v868_v43, 0.0  ;;  %v882_v5 = vmul.f32 %v1921_v18, %v851_v57  ;;  %v1969_v17 = vpop.f32.mrf.mxu1 }
  0xe2   : > { %v901_v63 = vsel %vm393_vm0, %v871_v51, 0.0  ;;  %v885_v7 = vmul.f32 %v1921_v18, %v854_v0  ;;  %vm791_vm7 = vcmp.ge.f32.partialorder %v767_v27, 0.0  ;;  %v769_v9 = vadd.f32 %v745_v13, %v1944_v42 }
  0xe3   : > { %v1964_v8 = vpop.f32.mrf.mxu0  ;;  %893 = vadd.xlane.f32.xlu0 %v892_v4  ;;  %902 = vadd.xlane.f32.xlu1 %v901_v63  ;;  %v783_v10 = vadd.f32 %v759_v19, %v1954_v56  ;;  %v839_v14 = vsel %vm791_vm7, %v767_v27, %v815_v45  ;;  %vm794_vm8 = vcmp.ge.f32.partialorder %v770_v38, 0.0  ;;  %v832_v15 = vmul.f32 0.2, %v784_v55 }
  0xe4   : > { %v943_v46 = vsel %vm393_vm0, %v885_v7, 0.0  ;;  %v842_v16 = vsel %vm794_vm8, %v770_v38, %v818_v54  ;;  %v761_v22 = vadd.f32 %v1891_v60, %v1877_v50  ;;  %v772_v25 = vadd.f32 %v1956_v61, %v748_v24  ;;  %v1986_v38 = vpop.f32.mrf.mxu1 }
  0xe5   : > { %v1973_v23 = vpop.f32.mrf.mxu0  ;;  %v873_v13 = vmul.f32 %v1921_v18, %v842_v16  ;;  %v762_v19 = vadd.f32 %v1951_v53, %v1869_v48  ;;  %v716_v26 = vrot.slane %v699_v3, %v1852_v40  ;;  %v934_v27 = vsel %vm393_vm0, %v882_v5, 0.0 }
  0xe6   : > { %v870_v28 = vmul.f32 %v1921_v18, %v839_v14  ;;  %vm805_vm9 = vcmp.ge.f32.partialorder %v781_v37, 0.0  ;;  %vm808_vm10 = vcmp.ge.f32.partialorder %v784_v55, 0.0  ;;  %v817_v60 = vmul.f32 0.2, %v769_v9 }
  0xe7   : > { %v1982_v31 = vpop.f32.mrf.mxu0  ;;  %v831_v33 = vmul.f32 0.2, %v783_v10  ;;  %935 = vadd.xlane.f32.xlu0 %v934_v27  ;;  %944 = vadd.xlane.f32.xlu1 %v943_v46  ;;  %v771_v24 = vadd.f32 %v747_v52, %v1964_v8  ;;  %v853_v35 = vsel %vm805_vm9, %v781_v37, %v829_v62  ;;  %v907_v36 = vsel %vm393_vm0, %v873_v13, 0.0 }
  0xe8   : > { %v856_v39 = vsel %vm808_vm10, %v784_v55, %v832_v15  ;;  %v749_v41 = vadd.f32 %v1905_v6, %v1877_v50  ;;  %v750_v45 = vadd.f32 %v716_v26, %v1869_v48  ;;  %vm807_vm11 = vcmp.ge.f32.partialorder %v783_v10, 0.0 }
  0xe9   : > { %v1990_v43 = vpop.f32.mrf.mxu0  ;;  %v887_v44 = vmul.f32 %v1921_v18, %v856_v39  ;;  %vm793_vm12 = vcmp.ge.f32.partialorder %v769_v9, 0.0  ;;  %v820_v51 = vmul.f32 0.2, %v772_v25  ;;  %v898_v52 = vsel %vm393_vm0, %v870_v28, 0.0 }
  0xea   : > { %v786_v37 = vadd.f32 %v1969_v17, %v762_v19  ;;  %v884_v54 = vmul.f32 %v1921_v18, %v853_v35  ;;  %v819_v57 = vmul.f32 0.2, %v771_v24  ;;  %v785_v6 = vadd.f32 %v761_v22, %v1986_v38 }
  0xeb   : > { %899 = vadd.xlane.f32.xlu0 %v898_v52  ;;  %908 = vadd.xlane.f32.xlu1 %v907_v36  ;;  %v855_v55 = vsel %vm807_vm11, %v783_v10, %v831_v33  ;;  %v841_v62 = vsel %vm793_vm12, %v769_v9, %v817_v60  ;;  %v949_v63 = vsel %vm393_vm0, %v887_v44, 0.0  ;;  %v1999_v0 = vpop.f32.mrf.mxu0  ;;  %vm795_vm13 = vcmp.ge.f32.partialorder %v771_v24, 0.0 }
  0xec   : > { %vm796_vm14 = vcmp.ge.f32.partialorder %v772_v25, 0.0  ;;  %v774_v3 = vadd.f32 %v1973_v23, %v750_v45  ;;  %v752_v4 = vadd.f32 %v716_v26, %v1877_v50  ;;  %v751_v5 = vadd.f32 %v716_v26, %v1864_v47  ;;  %v2022_v45 = vpop.f32.mrf.mxu1 }
  0xed   : > { %v834_v7 = vmul.f32 0.2, %v786_v37  ;;  %v940_v14 = vsel %vm393_vm0, %v884_v54, 0.0  ;;  %v886_v15 = vmul.f32 %v1921_v18, %v855_v55  ;;  %v872_v10 = vmul.f32 %v1921_v18, %v841_v62  ;;  %v2008_v13 = vpop.f32.mrf.mxu0 }
  0xee   : > { %v833_v9 = vmul.f32 0.2, %v785_v6  ;;  %v773_v46 = vadd.f32 %v749_v41, %v1982_v31  ;;  %v843_v16 = vsel %vm795_vm13, %v771_v24, %v819_v57  ;;  %v844_v22 = vsel %vm796_vm14, %v772_v25, %v820_v51 }
  0xef   : > { %941 = vadd.xlane.f32.xlu0 %v940_v14  ;;  %950 = vadd.xlane.f32.xlu1 %v949_v63  ;;  %vm809_vm15 = vcmp.ge.f32.partialorder %v785_v6, 0.0  ;;  %vm810_vm1 = vcmp.ge.f32.partialorder %v786_v37, 0.0  ;;  %v822_v19 = vmul.f32 0.2, %v774_v3  ;;  %v776_v26 = vadd.f32 %v1990_v43, %v752_v4  ;;  %v2020_v44 = vpop.f32.mrf.mxu0 }
  0xf0   : > { %v754_v27 = vadd.f32 %v1872_v49, %v1864_v47  ;;  %v753_v28 = vadd.f32 %v1872_v49, %v1869_v48  ;;  %v946_v60 = vsel %vm393_vm0, %v886_v15, 0.0  ;;  %v904_v33 = vsel %vm393_vm0, %v872_v10, 0.0 }
  0xf1   : > { %v874_v24 = vmul.f32 %v1921_v18, %v843_v16  ;;  %v875_v25 = vmul.f32 %v1921_v18, %v844_v22  ;;  %v821_v35 = vmul.f32 0.2, %v773_v46  ;;  %v775_v36 = vadd.f32 %v751_v5, %v1999_v0 }
  0xf2   : > { %v857_v39 = vsel %vm809_vm15, %v785_v6, %v833_v9  ;;  %v858_v41 = vsel %vm810_vm1, %v786_v37, %v834_v7  ;;  %vm797_vm2 = vcmp.ge.f32.partialorder %v773_v46, 0.0  ;;  %vm798_vm3 = vcmp.ge.f32.partialorder %v774_v3, 0.0  ;;  %v2034_v7 = vpop.f32.mrf.mxu1 }
  0xf3   : > { %947 = vadd.xlane.f32.xlu0 %v946_v60  ;;  %905 = vadd.xlane.f32.xlu1 %v904_v33  ;;  %v824_v49 = vmul.f32 0.2, %v776_v26  ;;  %v778_v51 = vadd.f32 %v2008_v13, %v754_v27  ;;  %v764_v52 = vadd.f32 %v1951_v53, %v1877_v50  ;;  %v763_v54 = vadd.f32 %v1951_v53, %v1864_v47 }
  0xf4   : > { %v910_v57 = vsel %vm393_vm0, %v874_v24, 0.0  ;;  %v913_v6 = vsel %vm393_vm0, %v875_v25, 0.0  ;;  %v888_v37 = vmul.f32 %v1921_v18, %v857_v39  ;;  %v889_v55 = vmul.f32 %v1921_v18, %v858_v41 }
  0xf5   : > { %v823_v62 = vmul.f32 0.2, %v775_v36  ;;  %v777_v63 = vadd.f32 %v753_v28, %v2020_v44  ;;  %v845_v4 = vsel %vm797_vm2, %v773_v46, %v821_v35  ;;  %v846_v5 = vsel %vm798_vm3, %v774_v3, %v822_v19 }
  0xf6   : > { %vm799_vm4 = vcmp.ge.f32.partialorder %v775_v36, 0.0  ;;  %vm800_vm5 = vcmp.ge.f32.partialorder %v776_v26, 0.0  ;;  %v826_v53 = vmul.f32 0.2, %v778_v51  ;;  %v788_v14 = vadd.f32 %v2022_v45, %v764_v52 }
  0xf7   : > { %911 = vadd.xlane.f32.xlu0 %v910_v57  ;;  %914 = vadd.xlane.f32.xlu1 %v913_v6  ;;  %v952_v15 = vsel %vm393_vm0, %v888_v37, 0.0  ;;  %v955_v10 = vsel %vm393_vm0, %v889_v55, 0.0  ;;  %v876_v9 = vmul.f32 %v1921_v18, %v845_v4  ;;  %v877_v16 = vmul.f32 %v1921_v18, %v846_v5 }
  0xf8   : > { %v825_v22 = vmul.f32 0.2, %v777_v63  ;;  %v787_v3 = vadd.f32 %v763_v54, %v2034_v7  ;;  %v847_v46 = vsel %vm799_vm4, %v775_v36, %v823_v62  ;;  %v848_v19 = vsel %vm800_vm5, %v776_v26, %v824_v49 }
  0xf9   : > { %vm801_vm6 = vcmp.ge.f32.partialorder %v777_v63, 0.0  ;;  %vm802_vm7 = vcmp.ge.f32.partialorder %v778_v51, 0.0  ;;  %v916_v27 = vsel %vm393_vm0, %v876_v9, 0.0  ;;  %v919_v28 = vsel %vm393_vm0, %v877_v16, 0.0 }
  0xfa   : > { %v878_v60 = vmul.f32 %v1921_v18, %v847_v46  ;;  %v879_v33 = vmul.f32 %v1921_v18, %v848_v19  ;;  %v836_v24 = vmul.f32 0.2, %v788_v14  ;;  %v835_v25 = vmul.f32 0.2, %v787_v3 }
  0xfb   : > { %953 = vadd.xlane.f32.xlu0 %v952_v15  ;;  %956 = vadd.xlane.f32.xlu1 %v955_v10  ;;  %v849_v35 = vsel %vm801_vm6, %v777_v63, %v825_v22  ;;  %v850_v39 = vsel %vm802_vm7, %v778_v51, %v826_v53  ;;  %vm811_vm8 = vcmp.ge.f32.partialorder %v787_v3, 0.0  ;;  %vm812_vm9 = vcmp.ge.f32.partialorder %v788_v14, 0.0 }
  0xfc   : > { %v922_v26 = vsel %vm393_vm0, %v878_v60, 0.0  ;;  %v925_v36 = vsel %vm393_vm0, %v879_v33, 0.0  ;;  %v880_v41 = vmul.f32 %v1921_v18, %v849_v35  ;;  %v881_v49 = vmul.f32 %v1921_v18, %v850_v39 }
  0xfd   : > { %v859_v52 = vsel %vm811_vm8, %v787_v3, %v835_v25  ;;  %v860_v54 = vsel %vm812_vm9, %v788_v14, %v836_v24  ;;  %v990_v46 = vand.u32 127, %v656_v30  ;;  %vm1000_vm10 = vcmask 130112  }
  0xfe   : > { %v928_v57 = vsel %vm393_vm0, %v880_v41, 0.0  ;;  %v931_v6 = vsel %vm393_vm0, %v881_v49, 0.0  ;;  %v890_v51 = vmul.f32 %v1921_v18, %v859_v52  ;;  %v891_v37 = vmul.f32 %v1921_v18, %v860_v54 }
  0xff   : > { %917 = vadd.xlane.f32.xlu0 %v916_v27  ;;  %920 = vadd.xlane.f32.xlu1 %v919_v28  ;;  %v995_v28 = vadd.s32 4294967288, %v990_v46  ;;  %v1002_v25 = vadd.s32 4294967280, %v990_v46  ;;  %v2073_v35 = vsub.s32 %v990_v46, %v1848_v32  ;;  %vm1007_vm11 = vcmask 195712  }
 0x100   : > { %v958_v55 = vsel %vm393_vm0, %v890_v51, 0.0  ;;  %v961_v62 = vsel %vm393_vm0, %v891_v37, 0.0  ;;  %vm1107_vm12 = vcmask 1041409   ;;  %vm1109_vm13 = vcmask 1042434  }
 0x101   : > { %v2070_v24 = vsub.s32 %v995_v28, %v1848_v32  ;;  %v2078_v41 = vsub.s32 %v1002_v25, %v1848_v32  ;;  %vm1111_vm14 = vcmask 1043459   ;;  %vm1113_vm15 = vcmask 1044484  }
 0x102   : > { %vm1115_vm1 = vcmask 1045509   ;;  %vm1117_vm2 = vcmask 1046534   ;;  %vm1119_vm3 = vcmask 1047559   ;;  %vm1123_vm5 = vcmask 195584  }
 0x103   : > { %923 = vadd.xlane.f32.xlu0 %v922_v26  ;;  %926 = vadd.xlane.f32.xlu1 %v925_v36  ;;  %vm1717_vm6 = vmmov 0  }
 0x107   : > { %929 = vadd.xlane.f32.xlu0 %v928_v57  ;;  %932 = vadd.xlane.f32.xlu1 %v931_v6 }
 0x10b   : > { %959 = vadd.xlane.f32.xlu0 %v958_v55  ;;  %962 = vadd.xlane.f32.xlu1 %v961_v62 }
 0x168   : > { %v897_v63 = vpop.xlane.xlu0 %896  ;;  %v939_v4 = vpop.xlane.xlu1 %938 }
 0x169   : > { %v999_v49 = vrot.slane %v897_v63, %v2070_v24 }
 0x16c   : > { %v894_v5 = vpop.xlane.xlu0 %893  ;;  %v903_v53 = vpop.xlane.xlu1 %902 }
 0x16d   : > { %v1012_v30 = vrot.slane %v903_v53, %v2073_v35  ;;  %v994_v52 = vrot.slane %v894_v5, %v2073_v35 }
 0x170   : > { %v2056_v14 = vpop.xlane.xlu0 %935  ;;  %v2058_v15 = vpop.xlane.xlu1 %944 }
 0x171   : > { %v1063_v28 = vrot.slane %v2056_v14, %v2078_v41  ;;  %v1077_v14 = vrot.slane %v2058_v15, %v2078_v41 }
 0x174   : > { %v900_v10 = vpop.xlane.xlu0 %899  ;;  %v909_v9 = vpop.xlane.xlu1 %908 }
 0x175   : > { %v1006_v6 = vrot.slane %v900_v10, %v2078_v41  ;;  %v1021_v51 = vrot.slane %v909_v9, %v2078_v41  ;;  %v1001_v10 = vsel %vm1000_vm10, %v999_v49, %v994_v52 }
 0x177   : > { %v1008_v25 = vsel %vm1007_vm11, %v1006_v6, %v1001_v10 }
 0x178   : > { %v942_v16 = vpop.xlane.xlu0 %941  ;;  %v2060_v18 = vpop.xlane.xlu1 %950 }
 0x17c   : > { %v2062_v22 = vpop.xlane.xlu0 %947  ;;  %v906_v3 = vpop.xlane.xlu1 %905 }
 0x17d   : > { %v1016_v39 = vrot.slane %v906_v3, %v2070_v24  ;;  %v1072_v3 = vrot.slane %v942_v16, %v2070_v24 }
 0x17f   : > { %v1017_v37 = vsel %vm1000_vm10, %v1016_v39, %v1012_v30 }
 0x180   : > { %v912_v19 = vpop.xlane.xlu0 %911  ;;  %v915_v27 = vpop.xlane.xlu1 %914  ;;  %v1022_v9 = vsel %vm1007_vm11, %v1021_v51, %v1017_v37 }
 0x181   : > { %v1026_v54 = vrot.slane %v912_v19, %v2073_v35  ;;  %v1030_v57 = vrot.slane %v915_v27, %v2070_v24  ;;  %v1068_v19 = vrot.slane %v939_v4, %v2073_v35  ;;  %v1082_v4 = vrot.slane %v2062_v22, %v2073_v35 }
 0x182   : > { %v1086_v22 = vrot.slane %v2060_v18, %v2070_v24  ;;  %v1108_v6 = vsel %vm1107_vm12, %v1022_v9, %v1008_v25 }
 0x183   : > { %v1031_v27 = vsel %vm1000_vm10, %v1030_v57, %v1026_v54  ;;  %v1073_v30 = vsel %vm1000_vm10, %v1072_v3, %v1068_v19 }
 0x184   : > { %v2065_v60 = vpop.xlane.xlu0 %953  ;;  %v2067_v33 = vpop.xlane.xlu1 %956 }
 0x185   : > { %v1091_v57 = vrot.slane %v2065_v60, %v2078_v41  ;;  %v1096_v60 = vrot.slane %v2067_v33, %v2073_v35 }
 0x188   : > { %v918_v26 = vpop.xlane.xlu0 %917  ;;  %v921_v36 = vpop.xlane.xlu1 %920 }
 0x189   : > { %v1035_v55 = vrot.slane %v918_v26, %v2078_v41  ;;  %v1040_v63 = vrot.slane %v921_v36, %v2073_v35 }
 0x18b   : > { %v1036_v39 = vsel %vm1007_vm11, %v1035_v55, %v1031_v27  ;;  %v1078_v55 = vsel %vm1007_vm11, %v1077_v14, %v1073_v30 }
 0x18c   : > { %v924_v62 = vpop.xlane.xlu0 %923  ;;  %v927_v53 = vpop.xlane.xlu1 %926  ;;  %v1110_v51 = vsel %vm1109_vm13, %v1036_v39, %v1108_v6  ;;  %v1197_v6 = vsub.s32 4, %v1848_v32 }
 0x18d   : > { %v1044_v5 = vrot.slane %v924_v62, %v2070_v24  ;;  %v1049_v46 = vrot.slane %v927_v53, %v2078_v41  ;;  %v1087_v62 = vsel %vm1000_vm10, %v1086_v22, %v1082_v4  ;;  %v1182_v22 = vsub.s32 3, %v1848_v32 }
 0x18e   : > { %v1092_v10 = vsel %vm1007_vm11, %v1091_v57, %v1087_v62 }
 0x18f   : > { %v1045_v16 = vsel %vm1000_vm10, %v1044_v5, %v1040_v63  ;;  %v364_v63 = vld [vmem:[%s351_s13] sm:$0xff] }
 0x190   : > { %v930_v26 = vpop.xlane.xlu0 %929  ;;  %v933_v36 = vpop.xlane.xlu1 %932  ;;  %v1050_v49 = vsel %vm1007_vm11, %v1049_v46, %v1045_v16  ;;  %vm964_vm4 = vcmp.gt.f32.partialorder %v364_v63, 0.0 }
 0x191   : > { %v1054_v52 = vrot.slane %v930_v26, %v2073_v35  ;;  %v1058_v54 = vrot.slane %v933_v36, %v2070_v24  ;;  %v1112_v15 = vsel %vm1111_vm14, %v1050_v49, %v1110_v51  ;;  %v1212_v51 = vsub.s32 5, %v1848_v32 }
 0x193   : > { %v1059_v37 = vsel %vm1000_vm10, %v1058_v54, %v1054_v52  ;;  %v1167_v52 = vsub.s32 2, %v1848_v32 }
 0x194   : > { %v1064_v53 = vsel %vm1007_vm11, %v1063_v28, %v1059_v37  ;;  %v960_v18 = vpop.xlane.xlu0 %959  ;;  %v963_v3 = vpop.xlane.xlu1 %962 }
 0x195   : > { %v1100_v5 = vrot.slane %v960_v18, %v2070_v24  ;;  %v1105_v46 = vrot.slane %v963_v3, %v2078_v41  ;;  %v1114_v19 = vsel %vm1113_vm15, %v1064_v53, %v1112_v15  ;;  %v1716_v41 = vmov 0.0  }
 0x196   : > { %v1116_v9 = vsel %vm1115_vm1, %v1078_v55, %v1114_v19  ;;  %1673 = vmatprep.subr.mxu1 %v1716_v41  ;;  %1679 = vmatprep.mubr.msk.f32.mxu1 %vm1717_vm6, %v1716_v41  ;;  %v1227_v55 = vsub.s32 6, %v1848_v32  ;;  %v1242_v15 = vsub.s32 7, %v1848_v32 }
 0x197   : > { %v1101_v27 = vsel %vm1000_vm10, %v1100_v5, %v1096_v60  ;;  %v1118_v16 = vsel %vm1117_vm2, %v1092_v10, %v1116_v9  ;;  %1674 = vmatpush3.msra.mxu1 %v1877_v50 }
 0x198   : > { %v1106_v28 = vsel %vm1007_vm11, %v1105_v46, %v1101_v27  ;;  %1675 = vmatprep.subr.mxu1 %v1716_v41 }
 0x199   : > { %v1120_v33 = vsel %vm1119_vm3, %v1106_v28, %v1118_v16  ;;  %1676 = vmatpush3.msra.mxu1 %v1864_v47 }
 0x19a   : > { %v1122_v24 = vsel %vm964_vm4, %v1120_v33, -1e+30  ;;  %1677 = vmatprep.subr.mxu1 %v1716_v41 }
 0x19b   : > { %v1124_v35 = vsel %vm1123_vm5, %v1122_v24, -inf  ;;  %1678 = vmatpush3.msra.mxu1 %v1869_v48  ;;  %v1152_v48 = vsub.s32 1, %v1848_v32 }
 0x19c   : > { %1125 = vmax.xlane.f32.xlu0 %v1124_v35 }
 0x225   : > { %v1126_v25 = vpop.xlane.xlu0 %1125 }
 0x226   : > { %v1127_v4 = vsub.f32 %v1122_v24, %v1126_v25 }
 0x228   : > { %v1128_v39 = vmul.f32 1.442695, %v1127_v4 }
 0x22a   : > { %1703 = vpow2.f32 %v1128_v39 }
 0x237   : > { %v1704_v26 = vpop.eup %1703 }
 0x238   : > { %v1130_v36 = vsel %vm1123_vm5, %v1704_v26, 0.0 }
 0x239   : > { %1131 = vadd.xlane.f32.xlu1 %v1130_v36 }
 0x2c2   : > { %v1132_v30 = vpop.xlane.xlu1 %1131 }
 0x2c3   : > { %1705 = vrcp.f32 %v1132_v30 }
 0x2d0   : > { %v1706_v49 = vpop.eup %1705 }
 0x2d1   : > { %v1134_v50 = vmul.f32 %v1706_v49, %v1704_v26 }
 0x2d3   : > { %1680 = vmatmul.mubr.msk.f32.vlgmr.msra.gmra.mxu1 %vm1123_vm5, %v1134_v50  ;;  %v1138_v47 = vrot.slane %v1134_v50, %v1852_v40  ;;  %v1153_v54 = vrot.slane %v1134_v50, %v1152_v48  ;;  %v1168_v14 = vrot.slane %v1134_v50, %v1167_v52  ;;  %v1183_v57 = vrot.slane %v1134_v50, %v1182_v22 }
 0x2d4   : > { %v1198_v40 = vrot.slane %v1134_v50, %v1197_v6  ;;  %v1213_v37 = vrot.slane %v1134_v50, %v1212_v51  ;;  %v1228_v62 = vrot.slane %v1134_v50, %v1227_v55  ;;  %v1243_v53 = vrot.slane %v1134_v50, %v1242_v15 }
 0x2d5   : > { %1144 = vbcast.lane.b32.xlu1 %v1138_v47, 264  ;;  %1140 = vbcast.lane.b32.xlu0 %v1138_v47, 256 }
 0x2d9   : > { %1155 = vbcast.lane.b32.xlu1 %v1153_v54, 256  ;;  %1170 = vbcast.lane.b32.xlu0 %v1168_v14, 256 }
 0x2dd   : > { %1159 = vbcast.lane.b32.xlu1 %v1153_v54, 264  ;;  %1148 = vbcast.lane.b32.xlu0 %v1138_v47, 272 }
 0x2e1   : > { %1174 = vbcast.lane.b32.xlu1 %v1168_v14, 264  ;;  %1185 = vbcast.lane.b32.xlu0 %v1183_v57, 256 }
 0x2e5   : > { %1163 = vbcast.lane.b32.xlu1 %v1153_v54, 272  ;;  %1178 = vbcast.lane.b32.xlu0 %v1168_v14, 272 }
 0x2e9   : > { %1189 = vbcast.lane.b32.xlu1 %v1183_v57, 264  ;;  %1204 = vbcast.lane.b32.xlu0 %v1198_v40, 264 }
 0x2ed   : > { %1200 = vbcast.lane.b32.xlu1 %v1198_v40, 256  ;;  %1215 = vbcast.lane.b32.xlu0 %v1213_v37, 256 }
 0x2f1   : > { %1193 = vbcast.lane.b32.xlu1 %v1183_v57, 272  ;;  %1208 = vbcast.lane.b32.xlu0 %v1198_v40, 272 }
 0x2f5   : > { %1219 = vbcast.lane.b32.xlu1 %v1213_v37, 264  ;;  %1234 = vbcast.lane.b32.xlu0 %v1228_v62, 264 }
 0x2f9   : > { %1230 = vbcast.lane.b32.xlu1 %v1228_v62, 256  ;;  %1245 = vbcast.lane.b32.xlu0 %v1243_v53, 256 }
 0x2fd   : > { %1223 = vbcast.lane.b32.xlu1 %v1213_v37, 272  ;;  %1238 = vbcast.lane.b32.xlu0 %v1228_v62, 272 }
 0x301   : > { %1249 = vbcast.lane.b32.xlu1 %v1243_v53, 264 }
 0x305   : > { %1253 = vbcast.lane.b32.xlu1 %v1243_v53, 272 }
 0x347   : > { %v1145_v18 = vpop.permute.xlu1 %1144  ;;  %v1141_v3 = vpop.permute.xlu0 %1140 }
 0x348   : > { %v1256_v35 = vmul.f32 %v1886_v58, %v1145_v18  ;;  %v1255_v41 = vmul.f32 %v1141_v3, %v1897_v1 }
 0x34a   : > { %v1280_v49 = vsel %vm393_vm0, %v1256_v35, 0.0  ;;  %v1279_v50 = vsel %vm393_vm0, %v1255_v41, 0.0 }
 0x34b   : > { %v1156_v63 = vpop.permute.xlu1 %1155  ;;  %v1171_v60 = vpop.permute.xlu0 %1170  ;;  %v1281_v22 = vadd.f32 %v1280_v49, %v1279_v50 }
 0x34c   : > { %v1258_v25 = vmul.f32 %v1909_v11, %v1156_v63  ;;  %v1261_v11 = vmul.f32 %v1171_v60, %v1964_v8 }
 0x34e   : > { %v1290_v1 = vsel %vm393_vm0, %v1258_v25, 0.0 }
 0x34f   : > { %v1160_v5 = vpop.permute.xlu1 %1159  ;;  %v1149_v46 = vpop.permute.xlu0 %1148 }
 0x350   : > { %v1259_v24 = vmul.f32 %v1160_v5, %v1944_v42  ;;  %v1257_v42 = vmul.f32 %v1149_v46, %v1925_v20 }
 0x352   : > { %v1291_v36 = vsel %vm393_vm0, %v1259_v24, 0.0  ;;  %v1282_v57 = vsel %vm393_vm0, %v1257_v42, 0.0 }
 0x353   : > { %v1175_v19 = vpop.permute.xlu1 %1174  ;;  %v1186_v10 = vpop.permute.xlu0 %1185  ;;  %v1292_v54 = vadd.f32 %v1291_v36, %v1290_v1  ;;  %v1283_v18 = vadd.f32 %v1282_v57, %v1281_v22 }
 0x354   : > { %v1262_v30 = vmul.f32 %v1956_v61, %v1175_v19  ;;  %v1264_v61 = vmul.f32 %v1973_v23, %v1186_v10 }
 0x356   : > { %v1302_v20 = vsel %vm393_vm0, %v1262_v30, 0.0 }
 0x357   : > { %v1164_v9 = vpop.permute.xlu1 %1163  ;;  %v1179_v27 = vpop.permute.xlu0 %1178 }
 0x358   : > { %v1260_v4 = vmul.f32 %v1934_v29, %v1164_v9  ;;  %v1263_v47 = vmul.f32 %v1179_v27, %v1982_v31  ;;  %v1301_v31 = vsel %vm393_vm0, %v1261_v11, 0.0 }
 0x359   : > { %v1303_v62 = vadd.f32 %v1302_v20, %v1301_v31 }
 0x35a   : > { %v1293_v29 = vsel %vm393_vm0, %v1260_v4, 0.0  ;;  %v1304_v51 = vsel %vm393_vm0, %v1263_v47, 0.0 }
 0x35b   : > { %v1190_v32 = vpop.permute.xlu1 %1189  ;;  %v1205_v16 = vpop.permute.xlu0 %1204  ;;  %v1294_v6 = vadd.f32 %v1293_v29, %v1292_v54  ;;  %v1305_v5 = vadd.f32 %v1304_v51, %v1303_v62 }
 0x35c   : > { %v1265_v58 = vmul.f32 %v1190_v32, %v1999_v0  ;;  %v1268_v23 = vmul.f32 %v2008_v13, %v1205_v16 }
 0x35d   : > { %v1295_v60 = vrot.slane %v1294_v6, 4  ;;  %v1306_v41 = vrot.slane %v1305_v5, 4 }
 0x35e   : > { %v1313_v8 = vsel %vm393_vm0, %v1265_v58, 0.0 }
 0x35f   : > { %v1201_v28 = vpop.permute.xlu1 %1200  ;;  %v1216_v33 = vpop.permute.xlu0 %1215  ;;  %v1296_v35 = vadd.f32 %v1295_v60, %v1294_v6  ;;  %v1307_v42 = vadd.f32 %v1306_v41, %v1305_v5 }
 0x360   : > { %v1267_v0 = vmul.f32 %v1201_v28, %v2020_v44  ;;  %v1312_v44 = vsel %vm393_vm0, %v1264_v61, 0.0  ;;  %v1270_v15 = vmul.f32 %v1888_v59, %v1216_v33  ;;  %v1284_v28 = vrot.slane %v1283_v18, 4 }
 0x361   : > { %v1314_v3 = vadd.f32 %v1313_v8, %v1312_v44  ;;  %v1297_v29 = vrot.slane %v1296_v35, 2  ;;  %v1308_v20 = vrot.slane %v1307_v42, 2 }
 0x362   : > { %v1334_v32 = vsel %vm393_vm0, %v1270_v15, 0.0  ;;  %v1285_v50 = vadd.f32 %v1284_v28, %v1283_v18 }
 0x363   : > { %v1194_v39 = vpop.permute.xlu1 %1193  ;;  %v1209_v26 = vpop.permute.xlu0 %1208  ;;  %v1298_v57 = vadd.f32 %v1297_v29, %v1296_v35 }
 0x364   : > { %v1266_v14 = vmul.f32 %v1990_v43, %v1194_v39  ;;  %v1269_v43 = vmul.f32 %v1209_v26, %v1899_v2  ;;  %v1324_v2 = vsel %vm393_vm0, %v1268_v23, 0.0  ;;  %v1309_v23 = vadd.f32 %v1308_v20, %v1307_v42 }
 0x366   : > { %v1315_v53 = vsel %vm393_vm0, %v1266_v14, 0.0  ;;  %v1326_v19 = vsel %vm393_vm0, %v1269_v43, 0.0  ;;  %v1286_v14 = vrot.slane %v1285_v50, 2 }
 0x367   : > { %v1220_v48 = vpop.permute.xlu1 %1219  ;;  %v1235_v52 = vpop.permute.xlu0 %1234  ;;  %v1316_v46 = vadd.f32 %v1315_v53, %v1314_v3  ;;  %v1310_v53 = vrot.slane %v1309_v23, 1 }
 0x368   : > { %v1271_v40 = vmul.f32 %v1220_v48, %v1927_v21  ;;  %v1323_v21 = vsel %vm393_vm0, %v1267_v0, 0.0  ;;  %v1274_v10 = vmul.f32 %v1938_v34, %v1235_v52  ;;  %v1287_v31 = vadd.f32 %v1286_v14, %v1285_v50 }
 0x369   : > { %v1325_v27 = vadd.f32 %v1324_v2, %v1323_v21  ;;  %v1317_v39 = vrot.slane %v1316_v46, 4  ;;  %v1311_v2 = vadd.f32 %v1310_v53, %v1309_v23 }
 0x36a   : > { %v1335_v13 = vsel %vm393_vm0, %v1271_v40, 0.0  ;;  %v1346_v34 = vsel %vm393_vm0, %v1274_v10, 0.0  ;;  %v1288_v15 = vrot.slane %v1287_v31, 1 }
 0x36b   : > { %v1231_v37 = vpop.permute.xlu1 %1230  ;;  %v1246_v55 = vpop.permute.xlu0 %1245  ;;  %v1336_v33 = vadd.f32 %v1335_v13, %v1334_v32  ;;  %v1327_v25 = vadd.f32 %v1326_v19, %v1325_v27  ;;  %v1318_v47 = vadd.f32 %v1317_v39, %v1316_v46 }
 0x36c   : > { %v1273_v63 = vmul.f32 %v1231_v37, %v1954_v56  ;;  %v1289_v13 = vadd.f32 %v1288_v15, %v1287_v31 }
 0x36d   : > { %v1328_v58 = vrot.slane %v1327_v25, 4  ;;  %v1319_v6 = vrot.slane %v1318_v47, 2 }
 0x36e   : > { %v1345_v24 = vsel %vm393_vm0, %v1273_v63, 0.0 }
 0x36f   : > { %v1224_v59 = vpop.permute.xlu1 %1223  ;;  %v1239_v9 = vpop.permute.xlu0 %1238  ;;  %v1347_v49 = vadd.f32 %v1346_v34, %v1345_v24  ;;  %v1320_v62 = vadd.f32 %v1319_v6, %v1318_v47 }
 0x370   : > { %v1272_v16 = vmul.f32 %v1911_v12, %v1224_v59  ;;  %v1275_v56 = vmul.f32 %v1239_v9, %v1986_v38  ;;  %v1276_v12 = vmul.f32 %v1969_v17, %v1246_v55  ;;  %v1329_v17 = vadd.f32 %v1328_v58, %v1327_v25 }
 0x371   : > { %v1299_v55 = vrot.slane %v1298_v57, 1  ;;  %v1321_v63 = vrot.slane %v1320_v62, 1 }
 0x372   : > { %v1337_v4 = vsel %vm393_vm0, %v1272_v16, 0.0  ;;  %v1348_v36 = vsel %vm393_vm0, %v1275_v56, 0.0  ;;  %v1356_v54 = vsel %vm393_vm0, %v1276_v12, 0.0  ;;  %v1330_v43 = vrot.slane %v1329_v17, 2 }
 0x373   : > { %v1338_v26 = vadd.f32 %v1337_v4, %v1336_v33  ;;  %v1250_v30 = vpop.permute.xlu1 %1249  ;;  %v1349_v1 = vadd.f32 %v1348_v36, %v1347_v49  ;;  %v1300_v21 = vadd.f32 %v1299_v55, %v1298_v57  ;;  %v1322_v59 = vadd.f32 %v1321_v63, %v1320_v62  ;;  %v1594_v36 = vld [vmem:[%s2225_s6] ss:$0 sm:$0xff] }
 0x374   : > { %v1277_v38 = vmul.f32 %v1250_v30, %v2034_v7  ;;  %v1331_v18 = vadd.f32 %v1330_v43, %v1329_v17 }
 0x375   : > { %v1339_v48 = vrot.slane %v1338_v26, 4  ;;  %v1350_v0 = vrot.slane %v1349_v1, 4  ;;  %v1375_v10 = vsel %vm1107_vm12, %v1300_v21, %v1289_v13 }
 0x376   : > { %v1357_v11 = vsel %vm393_vm0, %v1277_v38, 0.0  ;;  %v1332_v46 = vrot.slane %v1331_v18, 1  ;;  %v1376_v56 = vsel %vm1109_vm13, %v1311_v2, %v1375_v10  ;;  %v1465_v38 = vld [vmem:[%s355_s18] sm:$0xff] }
 0x377   : > { %v1254_v52 = vpop.permute.xlu1 %1253  ;;  %v1358_v22 = vadd.f32 %v1357_v11, %v1356_v54  ;;  %v1340_v8 = vadd.f32 %v1339_v48, %v1338_v26  ;;  %v1351_v37 = vadd.f32 %v1350_v0, %v1349_v1  ;;  %v1377_v24 = vsel %vm1111_vm14, %v1322_v59, %v1376_v56 }
 0x378   : > { %v1278_v61 = vmul.f32 %v2022_v45, %v1254_v52  ;;  %v1333_v32 = vadd.f32 %v1332_v46, %v1331_v18 }
 0x379   : > { %v1341_v44 = vrot.slane %v1340_v8, 2  ;;  %v1352_v3 = vrot.slane %v1351_v37, 2 }
 0x37a   : > { %v1359_v7 = vsel %vm393_vm0, %v1278_v61, 0.0  ;;  %v1378_v41 = vsel %vm1113_vm15, %v1333_v32, %v1377_v24 }
 0x37b   : > { %v1360_v40 = vadd.f32 %v1359_v7, %v1358_v22  ;;  %v1342_v60 = vadd.f32 %v1341_v44, %v1340_v8  ;;  %v1353_v19 = vadd.f32 %v1352_v3, %v1351_v37 }
 0x37d   : > { %v1361_v51 = vrot.slane %v1360_v40, 4  ;;  %v1343_v9 = vrot.slane %v1342_v60, 1  ;;  %v1354_v16 = vrot.slane %v1353_v19, 1 }
 0x37f   : > { %v1362_v45 = vadd.f32 %v1361_v51, %v1360_v40  ;;  %v1344_v28 = vadd.f32 %v1343_v9, %v1342_v60  ;;  %v1355_v35 = vadd.f32 %v1354_v16, %v1353_v19 }
 0x381   : > { %v1363_v5 = vrot.slane %v1362_v45, 2  ;;  %v1379_v4 = vsel %vm1115_vm1, %v1344_v28, %v1378_v41 }
 0x382   : > { %v1380_v39 = vsel %vm1117_vm2, %v1355_v35, %v1379_v4 }
 0x383   : > { %v1364_v27 = vadd.f32 %v1363_v5, %v1362_v45 }
 0x385   : > { %v1365_v33 = vrot.slane %v1364_v27, 1 }
 0x387   : > { %v1366_v25 = vadd.f32 %v1365_v33, %v1364_v27 }
 0x389   : > { %v1381_v34 = vsel %vm1119_vm3, %v1366_v25, %v1380_v39 }
 0x393   : > { %v1452_v26 = vpop.f32.mrf.mxu1 }
 0x394   : > { %v1453_v30 = vadd.f32 %v1452_v26, %v1381_v34 }
 0x395   : > { %v1681_v49 = vpop.f32.mrf.mxu1 }
 0x396   : > { %v1463_v12 = vadd.f32 %v1594_v36, %v1453_v30 }
 0x398   : > { %v1464_v50 = vmax.f32 %v1463_v12, 0.0 }
 0x39a   : > { %v1466_v42 = vadd.f32 %v1465_v38, %v1464_v50 }
 0x39c   : > { %1467 = vst.msk [vmem:[%s359_s22] sm:$0xff] %vm393_vm0, %v1466_v42 }
 0x39d PF: > { %s18_s27 = sadd.s32 1, %s1713_s27  }
 0x39e   : > { %p15_p5 = scmp.ge.s32.totalorder %s18_s27, 5  }
 0x3a0   :  { %17 = sbr.rel (!%p15_p5) target bundleno = 1 (0x1), region = 91 }

// kernel: gat_encoder_2.5
= control target key start
LH: loop header
LB: loop body
LE: loop exit
PB: predicated region body
PF: predicated region fallthrough
CT: control target
= control target key end

     0   :  { %13 = vsyncpa [#allocation3], 0  ;;  %s2390_s0 = inlined_call_operand.vmem [shape: f32[24,32], index: 0, kind: input, shape index: {}]   ;;  %s2391_s1 = inlined_call_operand.vmem [shape: f32[24,32], index: 1, kind: input, shape index: {}]   ;;  %s2392_s2 = inlined_call_operand.vmem [shape: f32[24,24,32], index: 2, kind: input, shape index: {}]   ;;  %s2393_s3 = inlined_call_operand.vmem [shape: f32[24,24], index: 3, kind: input, shape index: {}]   ;;  %s2394_s4 = inlined_call_operand.vmem [shape: f32[32,32], index: 4, kind: input, shape index: {}]   ;;  %s2395_s5 = inlined_call_operand.vmem [shape: f32[1,32], index: 5, kind: input, shape index: {}]   ;;  %s2396_s6 = inlined_call_operand.vmem [shape: f32[1,32], index: 6, kind: input, shape index: {}]   ;;  %s2397_s7 = inlined_call_operand.vmem [shape: f32[24,32], index: 7, kind: input, shape index: {}]   ;;  %s2398_s8 = inlined_call_operand.hbm [shape: f32[24,32], index: 8, kind: output, shape index: {}]  }
   0x1   :  { %15 = vsyncpa [#allocation3 + $0x1], 0  ;;  %s1869_s27 = smov 0   ;;  %s1871_s28 = smov 0  }
   0x2   :  { %s1873_s29 = smov 0   ;;  %s1875_s30 = smov 0  }
   0x3 LB: > { %s1890_s9 = sadd.s32 4294967295, %s1818_s30   ;;  %s1576_s10 = sadd.s32 4294967294, %s1818_s30   ;;  %s1818_s30 = sphi %s1875_s30, %s2404_s30   ;;  %s1814_s29 = sphi %s1873_s29, %s2403_s29   ;;  %s1810_s28 = sphi %s1871_s28, %s2402_s28   ;;  %s1806_s27 = sphi %s1869_s27, %s2401_s27  }
   0x4   : > { %s1894_s11 = sadd.s32 1, %s1818_s30   ;;  %s216_s12 = sadd.s32 1, %s1814_s29 }
   0x5   : > { %s213_s13 = ssub.s32 %s1818_s30, %s1894_s11  ;;  %p226_p0 = scmp.ne.s32.totalorder %s1814_s29, %s1810_s28 }
   0x6   : > { %p214_p1 = scmp.eq.s32.totalorder %s213_s13, 0  ;;  %p227_p2 = scmp.eq.s32.totalorder %s1890_s9, 2 }
   0x7   : > { %p232_p3 = scmp.ne.s32.totalorder %s1810_s28, %s1806_s27  ;;  %p233_p4 = scmp.eq.s32.totalorder %s1576_s10, 2 }
   0x8   : > { %s1905_s14 = scalar_select %p214_p1, %s1814_s29, %s216_s12  }
   0x9   : > { %p1907_p5 = por %p227_p2, %p226_p0  ;;  %p1911_p6 = por %p233_p4, %p232_p3 }
   0xa   : > { %p1579_p7 = scmp.ge.s32.totalorder %s1818_s30, 1  ;;  %p294_p8 = scmp.lt.s32.totalorder %s1818_s30, 4 }
   0xc   : > { %p295_p9 = pnand %p1579_p7, %p294_p8 }
   0xd   : > { %s1582_s21 = sshll.u32 (!%p295_p9), %s1890_s9, 3  ;;  %p341_p11 = scmp.lt.s32.totalorder (!%p295_p9), %s1890_s9, 2 }
   0xe   : > { %298 = sbr.rel (%p295_p9) target bundleno = 943 (0x3af), region = 52  ;;  %p346_p10 = scmp.lt.s32.totalorder (!%p295_p9), %s1582_s21, 23 }
   0xf   : > { %s1614_s12 = sshll.u32 (!%p295_p9), %s1890_s9, 7 }
  0x13   : > { %v392_v0 = vld [vmem:[%s2394_s4 + $0x18] sm:$0xff]  ;;  %v391_v1 = vld [vmem:[%s2394_s4 + $0x10] sm:$0xff]  ;;  %v390_v2 = vld [vmem:[%s2394_s4 + $0x8] sm:$0xff]  ;;  %s2406_s21 = smov (!%p346_p10, %s1582_s21), 23  ;;  %vm393_vm0 = vcmask 261120   ;;  %v656_v30 = vlaneseq }
  0x14   : > { %1649 = vmatprep.subr.mxu0 %v392_v0  ;;  %1702 = vmatprep.subr.mxu1 %v392_v0  ;;  %v389_v3 = vld [vmem:[%s2394_s4] sm:$0xff]  ;;  %s1710_s26 = smul.u32 24, %s2406_s21  ;;  %v1820_v28 = vmov 1966171168   ;;  %v2008_v47 = vld [vmem:[%s2390_s0 + $0x8] sm:$0xff]  ;;  %v2021_v50 = vld [vmem:[%s2390_s0 + $0x10] sm:$0xff] }
  0x15   : > { %1650 = vmatpush3.msra.mxu0 %v392_v0  ;;  %1706 = vmatpush3.msra.mxu1 %v392_v0  ;;  %s342_s17 = scalar_select %p341_p11, %s1890_s9, 2  ;;  %v654_v29 = vunpack.c.l.s4 %v1820_v28  ;;  %v1992_v32 = vshrl.u32 %v656_v30, 7  ;;  %v2013_v48 = vld [vmem:[%s2390_s0] sm:$0xff] }
  0x16   : > { %1651 = vmatprep.subr.mxu0 %v391_v1  ;;  %1703 = vmatprep.subr.mxu1 %v391_v1  ;;  %s1933_s13 = scalar_lea.vmem %s2392_s2, %s1710_s26 }
  0x17   : > { %1652 = vmatpush3.msra.mxu0 %v391_v1  ;;  %1707 = vmatpush3.msra.mxu1 %v391_v1  ;;  %v365_v4 = vld [vmem:[%s1933_s13] sm:$0xff]  ;;  %v379_v5 = vld [vmem:[%s1933_s13 + $0x70] sm:$0xff]  ;;  %v366_v6 = vld [vmem:[%s1933_s13 + $0x8] sm:$0xff]  ;;  %s1985_s18 = sshll.u32 %s342_s17, 3  ;;  %v655_v31 = vunpack.c.0.s8 %v654_v29  ;;  %v1996_v40 = vsub.s32 0, %v1992_v32 }
  0x18   : > { %1653 = vmatprep.subr.mxu0 %v390_v2  ;;  %1704 = vmatprep.subr.mxu1 %v390_v2  ;;  %v380_v7 = vld [vmem:[%s1933_s13 + $0x78] sm:$0xff]  ;;  %v367_v8 = vld [vmem:[%s1933_s13 + $0x10] sm:$0xff]  ;;  %v381_v9 = vld [vmem:[%s1933_s13 + $0x80] sm:$0xff]  ;;  %s344_s21 = scalar_lea.vmem %s2391_s1, %s1985_s18  ;;  %s355_s20 = scalar_lea.vmem %s2393_s3, %s1985_s18 }
  0x19   : > { %1654 = vmatpush3.msra.mxu0 %v390_v2  ;;  %1708 = vmatpush3.msra.mxu1 %v390_v2  ;;  %v368_v10 = vld [vmem:[%s1933_s13 + $0x18] sm:$0xff]  ;;  %v382_v11 = vld [vmem:[%s1933_s13 + $0x88] sm:$0xff]  ;;  %v369_v12 = vld [vmem:[%s1933_s13 + $0x20] sm:$0xff]  ;;  %v658_v35 = vsub.s32 %v655_v31, %v1992_v32  ;;  %s359_s25 = scalar_lea.vmem %s2397_s7, %s1985_s18 }
  0x1a   : > { %1655 = vmatprep.subr.mxu0 %v389_v3  ;;  %1705 = vmatprep.subr.mxu1 %v389_v3  ;;  %v383_v13 = vld [vmem:[%s1933_s13 + $0x90] sm:$0xff]  ;;  %v370_v14 = vld [vmem:[%s1933_s13 + $0x28] sm:$0xff]  ;;  %v384_v15 = vld [vmem:[%s1933_s13 + $0x98] sm:$0xff] }
  0x1b   : > { %1656 = vmatpush3.msra.mxu0 %v389_v3  ;;  %1709 = vmatpush3.msra.mxu1 %v389_v3  ;;  %v371_v16 = vld [vmem:[%s1933_s13 + $0x30] sm:$0xff]  ;;  %v385_v17 = vld [vmem:[%s1933_s13 + $0xa0] sm:$0xff]  ;;  %v372_v18 = vld [vmem:[%s1933_s13 + $0x38] sm:$0xff] }
  0x1c   : > { %1657 = vmatprep.mubr.msk.f32.mxu0 %vm393_vm0, %v365_v4  ;;  %1678 = vmatprep.mubr.msk.f32.mxu1 %vm393_vm0, %v379_v5  ;;  %v386_v19 = vld [vmem:[%s1933_s13 + $0xa8] sm:$0xff]  ;;  %v373_v20 = vld [vmem:[%s1933_s13 + $0x40] sm:$0xff]  ;;  %v387_v21 = vld [vmem:[%s1933_s13 + $0xb0] sm:$0xff] }
  0x1d   : > { %1658 = vmatmul.mubr.msk.f32.vlgmr.msra.gmra.mxu0 %vm393_vm0, %v366_v6  ;;  %1679 = vmatmul.mubr.msk.f32.vlgmr.msra.gmra.mxu1 %vm393_vm0, %v380_v7  ;;  %v374_v22 = vld [vmem:[%s1933_s13 + $0x48] sm:$0xff]  ;;  %v388_v23 = vld [vmem:[%s1933_s13 + $0xb8] sm:$0xff]  ;;  %v375_v24 = vld [vmem:[%s1933_s13 + $0x50] sm:$0xff] }
  0x1e   : > { %1660 = vmatprep.mubr.msk.f32.mxu0 %vm393_vm0, %v367_v8  ;;  %1681 = vmatprep.mubr.msk.f32.mxu1 %vm393_vm0, %v381_v9  ;;  %v376_v25 = vld [vmem:[%s1933_s13 + $0x58] sm:$0xff]  ;;  %v377_v26 = vld [vmem:[%s1933_s13 + $0x60] sm:$0xff]  ;;  %v378_v27 = vld [vmem:[%s1933_s13 + $0x68] sm:$0xff] }
  0x1f   : > { %v363_v33 = vld [vmem:[%s344_s21] sm:$0xff]  ;;  %s338_s21 = sand.u32 1, %s1810_s28  }
  0x20   : > { %v652_v34 = vcombine.high %v363_v33, %v363_v33  ;;  %v659_v37 = vrot.slane %v363_v33, %v658_v35  ;;  %s1580_s22 = sshll.u32 %s338_s21, 3  ;;  %s1468_s23 = scalar_lea.sflag [#allocation3], %s338_s21 }
  0x21   : > { %1661 = vmatmul.mubr.msk.f32.gmra.mxu0 %vm393_vm0, %v368_v10  ;;  %1682 = vmatmul.mubr.msk.f32.gmra.mxu1 %vm393_vm0, %v382_v11  ;;  %s340_s13 = scalar_lea.vmem [#allocation2], %s1580_s22 }
  0x22   : > { %1663 = vmatprep.mubr.msk.f32.mxu0 %vm393_vm0, %v369_v12  ;;  %1684 = vmatprep.mubr.msk.f32.mxu1 %vm393_vm0, %v383_v13  ;;  %v666_v36 = vrot.slane %v652_v34, %v658_v35  ;;  %v675_v39 = vrot.slane %v659_v37, %v658_v35  ;;  %v667_v42 = vcombine.high %v659_v37, %v659_v37  ;;  %s1481_s17 = sshll.u32 %s340_s13, 4  ;;  %s1482_s17 = int_to_ptr.vmem [resolvable:$true] %s1481_s17 }
  0x23   : > { %s1758_s24 = scalar_lea.vmem %s1482_s17, 128 }
  0x24   : > { %v668_v38 = vcombine.high %v666_v36, %v666_v36  ;;  %v682_v43 = vrot.slane %v666_v36, %v658_v35  ;;  %v704_v44 = vrot.slane %v675_v39, %v1996_v40  ;;  %v2003_v46 = vrot.slane %v667_v42, %v658_v35  ;;  %p1759_p12 = scmp.ne.s32.totalorder %s1482_s17, %s1758_s24 }
  0x25   : > { %1664 = vmatmul.mubr.msk.f32.gmra.mxu0 %vm393_vm0, %v370_v14  ;;  %1685 = vmatmul.mubr.msk.f32.gmra.mxu1 %vm393_vm0, %v384_v15  ;;  %v697_v55 = vcombine.high %v675_v39, %v675_v39 }
  0x26   : > { %1666 = vmatprep.mubr.msk.f32.mxu0 %vm393_vm0, %v371_v16  ;;  %1687 = vmatprep.mubr.msk.f32.mxu1 %vm393_vm0, %v385_v17  ;;  %v1998_v41 = vrot.slane %v668_v38, %v658_v35  ;;  %v2016_v49 = vrot.slane %v682_v43, %v1996_v40  ;;  %v698_v51 = vcombine.high %v682_v43, %v682_v43  ;;  %p1760_p13 = pnand %p1759_p12, %p1907_p5 }
  0x27   : > { %v742_v52 = vadd.f32 %v704_v44, %v2008_v47  ;;  %v708_v54 = vrot.slane %v2003_v46, %v1996_v40  ;;  %v741_v56 = vadd.f32 %v704_v44, %v2013_v48  ;;  %v743_v3 = vadd.f32 %v704_v44, %v2021_v50 }
  0x28   : > { %v724_v45 = vrot.slane %v1998_v41, %v1996_v40  ;;  %v755_v57 = vadd.f32 %v2016_v49, %v2021_v50  ;;  %v2035_v60 = vrot.slane %v698_v51, %v1996_v40  ;;  %v2049_v6 = vrot.slane %v697_v55, %v1996_v40  ;;  %p1761_p0 = pneg %p1760_p13 }
  0x29   : > { %1667 = vmatmul.mubr.msk.f32.gmra.mxu0 %vm393_vm0, %v372_v18  ;;  %1688 = vmatmul.mubr.msk.f32.gmra.mxu1 %vm393_vm0, %v386_v19  ;;  %v744_v63 = vadd.f32 %v708_v54, %v2013_v48  ;;  %v746_v5 = vadd.f32 %v708_v54, %v2021_v50  ;;  %v745_v13 = vadd.f32 %v708_v54, %v2008_v47  ;;  %v2065_v18 = vld [vmem:[%s2395_s5] ss:$0 sm:$0xff] }
  0x2a   : > { %1669 = vmatprep.mubr.msk.f32.mxu0 %vm393_vm0, %v373_v20  ;;  %1690 = vmatprep.mubr.msk.f32.mxu1 %vm393_vm0, %v387_v21  ;;  %v756_v53 = vadd.f32 %v724_v45, %v2013_v48  ;;  %v758_v0 = vadd.f32 %v724_v45, %v2021_v50  ;;  %v757_v4 = vadd.f32 %v724_v45, %v2008_v47 }
  0x2b   : > { %v760_v14 = vadd.f32 %v2035_v60, %v2008_v47  ;;  %v759_v19 = vadd.f32 %v2035_v60, %v2013_v48  ;;  %v700_v28 = vcombine.high %v1998_v41, %v1998_v41 }
  0x2d   : > { %1670 = vmatmul.mubr.msk.f32.gmra.mxu0 %vm393_vm0, %v374_v22  ;;  %1691 = vmatmul.mubr.msk.f32.gmra.mxu1 %vm393_vm0, %v388_v23 }
  0x2e   : > { %1672 = vmatprep.mubr.msk.f32.mxu0 %vm393_vm0, %v375_v24  ;;  %v748_v24 = vadd.f32 %v2049_v6, %v2008_v47 }
  0x31   : > { %1673 = vmatmul.mubr.msk.f32.gmra.mxu0 %vm393_vm0, %v376_v25 }
  0x32   : > { %1675 = vmatprep.mubr.msk.f32.mxu0 %vm393_vm0, %v377_v26 }
  0x35   : > { %1676 = vmatmul.mubr.msk.f32.gmra.mxu0 %vm393_vm0, %v378_v27 }
  0xdd   : > { %v2030_v58 = vpop.f32.mrf.mxu0  ;;  %v2032_v59 = vpop.f32.mrf.mxu1 }
  0xde   : > { %v766_v61 = vadd.f32 %v2030_v58, %v742_v52  ;;  %v780_v62 = vadd.f32 %v2032_v59, %v756_v53  ;;  %v747_v52 = vadd.f32 %v2049_v6, %v2013_v48  ;;  %v2095_v53 = vrot.slane %v700_v28, %v1996_v40 }
  0xdf   : > { %v2041_v1 = vpop.f32.mrf.mxu0  ;;  %v2043_v2 = vpop.f32.mrf.mxu1 }
  0xe0   : > { %v814_v7 = vmul.f32 0.2, %v766_v61  ;;  %v828_v8 = vmul.f32 0.2, %v780_v62  ;;  %v765_v9 = vadd.f32 %v741_v56, %v2041_v1  ;;  %v779_v10 = vadd.f32 %v755_v57, %v2043_v2 }
  0xe1   : > { %v2053_v11 = vpop.f32.mrf.mxu0  ;;  %v2055_v12 = vpop.f32.mrf.mxu1  ;;  %vm790_vm1 = vcmp.ge.f32.partialorder %v766_v61, 0.0  ;;  %vm804_vm2 = vcmp.ge.f32.partialorder %v780_v62, 0.0 }
  0xe2   : > { %v813_v15 = vmul.f32 0.2, %v765_v9  ;;  %v768_v16 = vadd.f32 %v2053_v11, %v744_v63  ;;  %v782_v17 = vadd.f32 %v2055_v12, %v758_v0  ;;  %v838_v22 = vsel %vm790_vm1, %v766_v61, %v814_v7 }
  0xe3   : > { %v2069_v20 = vpop.f32.mrf.mxu0  ;;  %v2071_v21 = vpop.f32.mrf.mxu1  ;;  %v852_v23 = vsel %vm804_vm2, %v780_v62, %v828_v8  ;;  %vm789_vm3 = vcmp.ge.f32.partialorder %v765_v9, 0.0  ;;  %v827_v25 = vmul.f32 0.2, %v779_v10  ;;  %v869_v31 = vmul.f32 %v2065_v18, %v838_v22 }
  0xe4   : > { %v816_v26 = vmul.f32 0.2, %v768_v16  ;;  %v767_v27 = vadd.f32 %v743_v3, %v2069_v20  ;;  %v883_v33 = vmul.f32 %v2065_v18, %v852_v23  ;;  %v837_v35 = vsel %vm789_vm3, %v765_v9, %v813_v15 }
  0xe5   : > { %v2078_v29 = vpop.f32.mrf.mxu0  ;;  %v2082_v34 = vpop.f32.mrf.mxu1  ;;  %vm792_vm4 = vcmp.ge.f32.partialorder %v768_v16, 0.0  ;;  %v830_v36 = vmul.f32 0.2, %v782_v17  ;;  %v781_v37 = vadd.f32 %v757_v4, %v2071_v21  ;;  %vm803_vm5 = vcmp.ge.f32.partialorder %v779_v10, 0.0 }
  0xe6   : > { %v770_v38 = vadd.f32 %v2078_v29, %v746_v5  ;;  %v895_v39 = vsel %vm393_vm0, %v869_v31, 0.0  ;;  %v937_v41 = vsel %vm393_vm0, %v883_v33, 0.0  ;;  %v868_v43 = vmul.f32 %v2065_v18, %v837_v35 }
  0xe7   : > { %v2088_v42 = vpop.f32.mrf.mxu0  ;;  %v840_v44 = vsel %vm792_vm4, %v768_v16, %v816_v26  ;;  %v815_v45 = vmul.f32 0.2, %v767_v27  ;;  %896 = vadd.xlane.f32.xlu0 %v895_v39  ;;  %938 = vadd.xlane.f32.xlu1 %v937_v41  ;;  %v784_v55 = vadd.f32 %v2082_v34, %v760_v14  ;;  %v2098_v56 = vpop.f32.mrf.mxu1  ;;  %v851_v57 = vsel %vm803_vm5, %v779_v10, %v827_v25 }
  0xe8   : > { %v871_v51 = vmul.f32 %v2065_v18, %v840_v44  ;;  %v818_v54 = vmul.f32 0.2, %v770_v38  ;;  %vm806_vm6 = vcmp.ge.f32.partialorder %v782_v17, 0.0  ;;  %v829_v62 = vmul.f32 0.2, %v781_v37 }
  0xe9   : > { %v2100_v61 = vpop.f32.mrf.mxu0  ;;  %v854_v0 = vsel %vm806_vm6, %v782_v17, %v830_v36  ;;  %v699_v3 = vcombine.high %v2003_v46, %v2003_v46  ;;  %v892_v4 = vsel %vm393_vm0, %v868_v43, 0.0  ;;  %v882_v5 = vmul.f32 %v2065_v18, %v851_v57  ;;  %v2113_v17 = vpop.f32.mrf.mxu1 }
  0xea   : > { %v901_v63 = vsel %vm393_vm0, %v871_v51, 0.0  ;;  %v885_v7 = vmul.f32 %v2065_v18, %v854_v0  ;;  %vm791_vm7 = vcmp.ge.f32.partialorder %v767_v27, 0.0  ;;  %v769_v9 = vadd.f32 %v745_v13, %v2088_v42 }
  0xeb   : > { %v2108_v8 = vpop.f32.mrf.mxu0  ;;  %893 = vadd.xlane.f32.xlu0 %v892_v4  ;;  %902 = vadd.xlane.f32.xlu1 %v901_v63  ;;  %v783_v10 = vadd.f32 %v759_v19, %v2098_v56  ;;  %v839_v14 = vsel %vm791_vm7, %v767_v27, %v815_v45  ;;  %vm794_vm8 = vcmp.ge.f32.partialorder %v770_v38, 0.0  ;;  %v832_v15 = vmul.f32 0.2, %v784_v55 }
  0xec   : > { %v943_v46 = vsel %vm393_vm0, %v885_v7, 0.0  ;;  %v842_v16 = vsel %vm794_vm8, %v770_v38, %v818_v54  ;;  %v761_v22 = vadd.f32 %v2035_v60, %v2021_v50  ;;  %v772_v25 = vadd.f32 %v2100_v61, %v748_v24  ;;  %v2130_v38 = vpop.f32.mrf.mxu1 }
  0xed   : > { %v2117_v23 = vpop.f32.mrf.mxu0  ;;  %v873_v13 = vmul.f32 %v2065_v18, %v842_v16  ;;  %v762_v19 = vadd.f32 %v2095_v53, %v2013_v48  ;;  %v716_v26 = vrot.slane %v699_v3, %v1996_v40  ;;  %v934_v27 = vsel %vm393_vm0, %v882_v5, 0.0 }
  0xee   : > { %v870_v28 = vmul.f32 %v2065_v18, %v839_v14  ;;  %vm805_vm9 = vcmp.ge.f32.partialorder %v781_v37, 0.0  ;;  %vm808_vm10 = vcmp.ge.f32.partialorder %v784_v55, 0.0  ;;  %v817_v60 = vmul.f32 0.2, %v769_v9 }
  0xef   : > { %v2126_v31 = vpop.f32.mrf.mxu0  ;;  %v831_v33 = vmul.f32 0.2, %v783_v10  ;;  %935 = vadd.xlane.f32.xlu0 %v934_v27  ;;  %944 = vadd.xlane.f32.xlu1 %v943_v46  ;;  %v771_v24 = vadd.f32 %v747_v52, %v2108_v8  ;;  %v853_v35 = vsel %vm805_vm9, %v781_v37, %v829_v62  ;;  %v907_v36 = vsel %vm393_vm0, %v873_v13, 0.0 }
  0xf0   : > { %v856_v39 = vsel %vm808_vm10, %v784_v55, %v832_v15  ;;  %v749_v41 = vadd.f32 %v2049_v6, %v2021_v50  ;;  %v750_v45 = vadd.f32 %v716_v26, %v2013_v48  ;;  %vm807_vm11 = vcmp.ge.f32.partialorder %v783_v10, 0.0 }
  0xf1   : > { %v2134_v43 = vpop.f32.mrf.mxu0  ;;  %v887_v44 = vmul.f32 %v2065_v18, %v856_v39  ;;  %vm793_vm12 = vcmp.ge.f32.partialorder %v769_v9, 0.0  ;;  %v820_v51 = vmul.f32 0.2, %v772_v25  ;;  %v898_v52 = vsel %vm393_vm0, %v870_v28, 0.0 }
  0xf2   : > { %v786_v37 = vadd.f32 %v2113_v17, %v762_v19  ;;  %v884_v54 = vmul.f32 %v2065_v18, %v853_v35  ;;  %v819_v57 = vmul.f32 0.2, %v771_v24  ;;  %v785_v6 = vadd.f32 %v761_v22, %v2130_v38 }
  0xf3   : > { %899 = vadd.xlane.f32.xlu0 %v898_v52  ;;  %908 = vadd.xlane.f32.xlu1 %v907_v36  ;;  %v855_v55 = vsel %vm807_vm11, %v783_v10, %v831_v33  ;;  %v841_v62 = vsel %vm793_vm12, %v769_v9, %v817_v60  ;;  %v949_v63 = vsel %vm393_vm0, %v887_v44, 0.0  ;;  %v2143_v0 = vpop.f32.mrf.mxu0  ;;  %vm795_vm13 = vcmp.ge.f32.partialorder %v771_v24, 0.0 }
  0xf4   : > { %vm796_vm14 = vcmp.ge.f32.partialorder %v772_v25, 0.0  ;;  %v774_v3 = vadd.f32 %v2117_v23, %v750_v45  ;;  %v752_v4 = vadd.f32 %v716_v26, %v2021_v50  ;;  %v751_v5 = vadd.f32 %v716_v26, %v2008_v47  ;;  %v2166_v45 = vpop.f32.mrf.mxu1 }
  0xf5   : > { %v834_v7 = vmul.f32 0.2, %v786_v37  ;;  %v940_v14 = vsel %vm393_vm0, %v884_v54, 0.0  ;;  %v886_v15 = vmul.f32 %v2065_v18, %v855_v55  ;;  %v872_v10 = vmul.f32 %v2065_v18, %v841_v62  ;;  %v2152_v13 = vpop.f32.mrf.mxu0 }
  0xf6   : > { %v833_v9 = vmul.f32 0.2, %v785_v6  ;;  %v773_v46 = vadd.f32 %v749_v41, %v2126_v31  ;;  %v843_v16 = vsel %vm795_vm13, %v771_v24, %v819_v57  ;;  %v844_v22 = vsel %vm796_vm14, %v772_v25, %v820_v51 }
  0xf7   : > { %941 = vadd.xlane.f32.xlu0 %v940_v14  ;;  %950 = vadd.xlane.f32.xlu1 %v949_v63  ;;  %vm809_vm15 = vcmp.ge.f32.partialorder %v785_v6, 0.0  ;;  %vm810_vm1 = vcmp.ge.f32.partialorder %v786_v37, 0.0  ;;  %v822_v19 = vmul.f32 0.2, %v774_v3  ;;  %v776_v26 = vadd.f32 %v2134_v43, %v752_v4  ;;  %v2164_v44 = vpop.f32.mrf.mxu0 }
  0xf8   : > { %v754_v27 = vadd.f32 %v2016_v49, %v2008_v47  ;;  %v753_v28 = vadd.f32 %v2016_v49, %v2013_v48  ;;  %v946_v60 = vsel %vm393_vm0, %v886_v15, 0.0  ;;  %v904_v33 = vsel %vm393_vm0, %v872_v10, 0.0 }
  0xf9   : > { %v874_v24 = vmul.f32 %v2065_v18, %v843_v16  ;;  %v875_v25 = vmul.f32 %v2065_v18, %v844_v22  ;;  %v821_v35 = vmul.f32 0.2, %v773_v46  ;;  %v775_v36 = vadd.f32 %v751_v5, %v2143_v0 }
  0xfa   : > { %v857_v39 = vsel %vm809_vm15, %v785_v6, %v833_v9  ;;  %v858_v41 = vsel %vm810_vm1, %v786_v37, %v834_v7  ;;  %vm797_vm2 = vcmp.ge.f32.partialorder %v773_v46, 0.0  ;;  %vm798_vm3 = vcmp.ge.f32.partialorder %v774_v3, 0.0  ;;  %v2178_v7 = vpop.f32.mrf.mxu1 }
  0xfb   : > { %947 = vadd.xlane.f32.xlu0 %v946_v60  ;;  %905 = vadd.xlane.f32.xlu1 %v904_v33  ;;  %v824_v49 = vmul.f32 0.2, %v776_v26  ;;  %v778_v51 = vadd.f32 %v2152_v13, %v754_v27  ;;  %v764_v52 = vadd.f32 %v2095_v53, %v2021_v50  ;;  %v763_v54 = vadd.f32 %v2095_v53, %v2008_v47 }
  0xfc   : > { %v910_v57 = vsel %vm393_vm0, %v874_v24, 0.0  ;;  %v913_v6 = vsel %vm393_vm0, %v875_v25, 0.0  ;;  %v888_v37 = vmul.f32 %v2065_v18, %v857_v39  ;;  %v889_v55 = vmul.f32 %v2065_v18, %v858_v41 }
  0xfd   : > { %v823_v62 = vmul.f32 0.2, %v775_v36  ;;  %v777_v63 = vadd.f32 %v753_v28, %v2164_v44  ;;  %v845_v4 = vsel %vm797_vm2, %v773_v46, %v821_v35  ;;  %v846_v5 = vsel %vm798_vm3, %v774_v3, %v822_v19 }
  0xfe   : > { %vm799_vm4 = vcmp.ge.f32.partialorder %v775_v36, 0.0  ;;  %vm800_vm5 = vcmp.ge.f32.partialorder %v776_v26, 0.0  ;;  %v826_v53 = vmul.f32 0.2, %v778_v51  ;;  %v788_v14 = vadd.f32 %v2166_v45, %v764_v52 }
  0xff   : > { %911 = vadd.xlane.f32.xlu0 %v910_v57  ;;  %914 = vadd.xlane.f32.xlu1 %v913_v6  ;;  %v952_v15 = vsel %vm393_vm0, %v888_v37, 0.0  ;;  %v955_v10 = vsel %vm393_vm0, %v889_v55, 0.0  ;;  %v876_v9 = vmul.f32 %v2065_v18, %v845_v4  ;;  %v877_v16 = vmul.f32 %v2065_v18, %v846_v5 }
 0x100   : > { %v825_v22 = vmul.f32 0.2, %v777_v63  ;;  %v787_v3 = vadd.f32 %v763_v54, %v2178_v7  ;;  %v847_v46 = vsel %vm799_vm4, %v775_v36, %v823_v62  ;;  %v848_v19 = vsel %vm800_vm5, %v776_v26, %v824_v49 }
 0x101   : > { %vm801_vm6 = vcmp.ge.f32.partialorder %v777_v63, 0.0  ;;  %vm802_vm7 = vcmp.ge.f32.partialorder %v778_v51, 0.0  ;;  %v916_v27 = vsel %vm393_vm0, %v876_v9, 0.0  ;;  %v919_v28 = vsel %vm393_vm0, %v877_v16, 0.0 }
 0x102   : > { %v878_v60 = vmul.f32 %v2065_v18, %v847_v46  ;;  %v879_v33 = vmul.f32 %v2065_v18, %v848_v19  ;;  %v836_v24 = vmul.f32 0.2, %v788_v14  ;;  %v835_v25 = vmul.f32 0.2, %v787_v3 }
 0x103   : > { %953 = vadd.xlane.f32.xlu0 %v952_v15  ;;  %956 = vadd.xlane.f32.xlu1 %v955_v10  ;;  %v849_v35 = vsel %vm801_vm6, %v777_v63, %v825_v22  ;;  %v850_v39 = vsel %vm802_vm7, %v778_v51, %v826_v53  ;;  %vm811_vm8 = vcmp.ge.f32.partialorder %v787_v3, 0.0  ;;  %vm812_vm9 = vcmp.ge.f32.partialorder %v788_v14, 0.0 }
 0x104   : > { %v922_v26 = vsel %vm393_vm0, %v878_v60, 0.0  ;;  %v925_v36 = vsel %vm393_vm0, %v879_v33, 0.0  ;;  %v880_v41 = vmul.f32 %v2065_v18, %v849_v35  ;;  %v881_v49 = vmul.f32 %v2065_v18, %v850_v39 }
 0x105   : > { %v859_v52 = vsel %vm811_vm8, %v787_v3, %v835_v25  ;;  %v860_v54 = vsel %vm812_vm9, %v788_v14, %v836_v24  ;;  %v990_v46 = vand.u32 127, %v656_v30  ;;  %vm1000_vm10 = vcmask 130112  }
 0x106   : > { %v928_v57 = vsel %vm393_vm0, %v880_v41, 0.0  ;;  %v931_v6 = vsel %vm393_vm0, %v881_v49, 0.0  ;;  %v890_v51 = vmul.f32 %v2065_v18, %v859_v52  ;;  %v891_v37 = vmul.f32 %v2065_v18, %v860_v54 }
 0x107   : > { %917 = vadd.xlane.f32.xlu0 %v916_v27  ;;  %920 = vadd.xlane.f32.xlu1 %v919_v28  ;;  %v995_v28 = vadd.s32 4294967288, %v990_v46  ;;  %v1002_v25 = vadd.s32 4294967280, %v990_v46  ;;  %v2217_v35 = vsub.s32 %v990_v46, %v1992_v32  ;;  %vm1007_vm11 = vcmask 195712  }
 0x108   : > { %v958_v55 = vsel %vm393_vm0, %v890_v51, 0.0  ;;  %v961_v62 = vsel %vm393_vm0, %v891_v37, 0.0  ;;  %vm1107_vm12 = vcmask 1041409   ;;  %vm1109_vm13 = vcmask 1042434  }
 0x109   : > { %v2214_v24 = vsub.s32 %v995_v28, %v1992_v32  ;;  %v2222_v41 = vsub.s32 %v1002_v25, %v1992_v32  ;;  %vm1111_vm14 = vcmask 1043459   ;;  %vm1113_vm15 = vcmask 1044484  }
 0x10a   : > { %vm1115_vm1 = vcmask 1045509   ;;  %vm1117_vm2 = vcmask 1046534   ;;  %vm1119_vm3 = vcmask 1047559   ;;  %vm1123_vm5 = vcmask 195584  }
 0x10b   : > { %923 = vadd.xlane.f32.xlu0 %v922_v26  ;;  %926 = vadd.xlane.f32.xlu1 %v925_v36  ;;  %vm1822_vm6 = vmmov 0  }
 0x10f   : > { %929 = vadd.xlane.f32.xlu0 %v928_v57  ;;  %932 = vadd.xlane.f32.xlu1 %v931_v6 }
 0x113   : > { %959 = vadd.xlane.f32.xlu0 %v958_v55  ;;  %962 = vadd.xlane.f32.xlu1 %v961_v62 }
 0x170   : > { %v897_v63 = vpop.xlane.xlu0 %896  ;;  %v939_v4 = vpop.xlane.xlu1 %938 }
 0x171   : > { %v999_v49 = vrot.slane %v897_v63, %v2214_v24 }
 0x174   : > { %v894_v5 = vpop.xlane.xlu0 %893  ;;  %v903_v53 = vpop.xlane.xlu1 %902 }
 0x175   : > { %v1012_v30 = vrot.slane %v903_v53, %v2217_v35  ;;  %v994_v52 = vrot.slane %v894_v5, %v2217_v35 }
 0x178   : > { %v2200_v14 = vpop.xlane.xlu0 %935  ;;  %v2202_v15 = vpop.xlane.xlu1 %944 }
 0x179   : > { %v1063_v28 = vrot.slane %v2200_v14, %v2222_v41  ;;  %v1077_v14 = vrot.slane %v2202_v15, %v2222_v41 }
 0x17c   : > { %v900_v10 = vpop.xlane.xlu0 %899  ;;  %v909_v9 = vpop.xlane.xlu1 %908 }
 0x17d   : > { %v1006_v6 = vrot.slane %v900_v10, %v2222_v41  ;;  %v1021_v51 = vrot.slane %v909_v9, %v2222_v41  ;;  %v1001_v10 = vsel %vm1000_vm10, %v999_v49, %v994_v52 }
 0x17f   : > { %v1008_v25 = vsel %vm1007_vm11, %v1006_v6, %v1001_v10 }
 0x180   : > { %v942_v16 = vpop.xlane.xlu0 %941  ;;  %v2204_v18 = vpop.xlane.xlu1 %950 }
 0x184   : > { %v2206_v22 = vpop.xlane.xlu0 %947  ;;  %v906_v3 = vpop.xlane.xlu1 %905 }
 0x185   : > { %v1016_v39 = vrot.slane %v906_v3, %v2214_v24  ;;  %v1072_v3 = vrot.slane %v942_v16, %v2214_v24 }
 0x187   : > { %v1017_v37 = vsel %vm1000_vm10, %v1016_v39, %v1012_v30 }
 0x188   : > { %v912_v19 = vpop.xlane.xlu0 %911  ;;  %v915_v27 = vpop.xlane.xlu1 %914  ;;  %v1022_v9 = vsel %vm1007_vm11, %v1021_v51, %v1017_v37 }
 0x189   : > { %v1026_v54 = vrot.slane %v912_v19, %v2217_v35  ;;  %v1030_v57 = vrot.slane %v915_v27, %v2214_v24  ;;  %v1068_v19 = vrot.slane %v939_v4, %v2217_v35  ;;  %v1082_v4 = vrot.slane %v2206_v22, %v2217_v35 }
 0x18a   : > { %v1086_v22 = vrot.slane %v2204_v18, %v2214_v24  ;;  %v1108_v6 = vsel %vm1107_vm12, %v1022_v9, %v1008_v25 }
 0x18b   : > { %v1031_v27 = vsel %vm1000_vm10, %v1030_v57, %v1026_v54  ;;  %v1073_v30 = vsel %vm1000_vm10, %v1072_v3, %v1068_v19 }
 0x18c   : > { %v2209_v60 = vpop.xlane.xlu0 %953  ;;  %v2211_v33 = vpop.xlane.xlu1 %956 }
 0x18d   : > { %v1091_v57 = vrot.slane %v2209_v60, %v2222_v41  ;;  %v1096_v60 = vrot.slane %v2211_v33, %v2217_v35 }
 0x190   : > { %v918_v26 = vpop.xlane.xlu0 %917  ;;  %v921_v36 = vpop.xlane.xlu1 %920 }
 0x191   : > { %v1035_v55 = vrot.slane %v918_v26, %v2222_v41  ;;  %v1040_v63 = vrot.slane %v921_v36, %v2217_v35 }
 0x193   : > { %v1036_v39 = vsel %vm1007_vm11, %v1035_v55, %v1031_v27  ;;  %v1078_v55 = vsel %vm1007_vm11, %v1077_v14, %v1073_v30 }
 0x194   : > { %v924_v62 = vpop.xlane.xlu0 %923  ;;  %v927_v53 = vpop.xlane.xlu1 %926  ;;  %v1110_v51 = vsel %vm1109_vm13, %v1036_v39, %v1108_v6  ;;  %v1197_v6 = vsub.s32 4, %v1992_v32 }
 0x195   : > { %v1044_v5 = vrot.slane %v924_v62, %v2214_v24  ;;  %v1049_v46 = vrot.slane %v927_v53, %v2222_v41  ;;  %v1087_v62 = vsel %vm1000_vm10, %v1086_v22, %v1082_v4  ;;  %v1182_v22 = vsub.s32 3, %v1992_v32 }
 0x196   : > { %v1092_v10 = vsel %vm1007_vm11, %v1091_v57, %v1087_v62 }
 0x197   : > { %v1045_v16 = vsel %vm1000_vm10, %v1044_v5, %v1040_v63  ;;  %v364_v63 = vld [vmem:[%s355_s20] sm:$0xff]  ;;  %s1479_s20 = scalar_lea.hbm %s2398_s8, %s1614_s12 }
 0x198   : > { %v930_v26 = vpop.xlane.xlu0 %929  ;;  %v933_v36 = vpop.xlane.xlu1 %932  ;;  %v1050_v49 = vsel %vm1007_vm11, %v1049_v46, %v1045_v16  ;;  %vm964_vm4 = vcmp.gt.f32.partialorder %v364_v63, 0.0 }
 0x199   : > { %v1054_v52 = vrot.slane %v930_v26, %v2217_v35  ;;  %v1058_v54 = vrot.slane %v933_v36, %v2214_v24  ;;  %v1112_v15 = vsel %vm1111_vm14, %v1050_v49, %v1110_v51  ;;  %v1212_v51 = vsub.s32 5, %v1992_v32 }
 0x19b   : > { %v1059_v37 = vsel %vm1000_vm10, %v1058_v54, %v1054_v52  ;;  %v1167_v52 = vsub.s32 2, %v1992_v32 }
 0x19c   : > { %v1064_v53 = vsel %vm1007_vm11, %v1063_v28, %v1059_v37  ;;  %v960_v18 = vpop.xlane.xlu0 %959  ;;  %v963_v3 = vpop.xlane.xlu1 %962 }
 0x19d   : > { %v1100_v5 = vrot.slane %v960_v18, %v2214_v24  ;;  %v1105_v46 = vrot.slane %v963_v3, %v2222_v41  ;;  %v1114_v19 = vsel %vm1113_vm15, %v1064_v53, %v1112_v15  ;;  %v1821_v41 = vmov 0.0  }
 0x19e   : > { %v1116_v9 = vsel %vm1115_vm1, %v1078_v55, %v1114_v19  ;;  %1693 = vmatprep.subr.mxu1 %v1821_v41  ;;  %1699 = vmatprep.mubr.msk.f32.mxu1 %vm1822_vm6, %v1821_v41  ;;  %v1227_v55 = vsub.s32 6, %v1992_v32  ;;  %v1242_v15 = vsub.s32 7, %v1992_v32 }
 0x19f   : > { %v1101_v27 = vsel %vm1000_vm10, %v1100_v5, %v1096_v60  ;;  %v1118_v16 = vsel %vm1117_vm2, %v1092_v10, %v1116_v9  ;;  %1694 = vmatpush3.msra.mxu1 %v2021_v50 }
 0x1a0   : > { %v1106_v28 = vsel %vm1007_vm11, %v1105_v46, %v1101_v27  ;;  %1695 = vmatprep.subr.mxu1 %v1821_v41 }
 0x1a1   : > { %v1120_v33 = vsel %vm1119_vm3, %v1106_v28, %v1118_v16  ;;  %1696 = vmatpush3.msra.mxu1 %v2008_v47 }
 0x1a2   : > { %v1122_v24 = vsel %vm964_vm4, %v1120_v33, -1e+30  ;;  %1697 = vmatprep.subr.mxu1 %v1821_v41 }
 0x1a3   : > { %v1124_v35 = vsel %vm1123_vm5, %v1122_v24, -inf  ;;  %1698 = vmatpush3.msra.mxu1 %v2013_v48  ;;  %v1152_v48 = vsub.s32 1, %v1992_v32 }
 0x1a4   : > { %1125 = vmax.xlane.f32.xlu0 %v1124_v35 }
 0x22d   : > { %v1126_v25 = vpop.xlane.xlu0 %1125 }
 0x22e   : > { %v1127_v4 = vsub.f32 %v1122_v24, %v1126_v25 }
 0x230   : > { %v1128_v39 = vmul.f32 1.442695, %v1127_v4 }
 0x232   : > { %1754 = vpow2.f32 %v1128_v39 }
 0x23f   : > { %v1755_v26 = vpop.eup %1754 }
 0x240   : > { %v1130_v36 = vsel %vm1123_vm5, %v1755_v26, 0.0 }
 0x241   : > { %1131 = vadd.xlane.f32.xlu1 %v1130_v36 }
 0x2ca   : > { %v1132_v30 = vpop.xlane.xlu1 %1131 }
 0x2cb   : > { %1756 = vrcp.f32 %v1132_v30 }
 0x2d8   : > { %v1757_v49 = vpop.eup %1756 }
 0x2d9   : > { %v1134_v50 = vmul.f32 %v1757_v49, %v1755_v26 }
 0x2db   : > { %1700 = vmatmul.mubr.msk.f32.vlgmr.msra.gmra.mxu1 %vm1123_vm5, %v1134_v50  ;;  %v1138_v47 = vrot.slane %v1134_v50, %v1996_v40  ;;  %v1153_v54 = vrot.slane %v1134_v50, %v1152_v48  ;;  %v1168_v14 = vrot.slane %v1134_v50, %v1167_v52  ;;  %v1183_v57 = vrot.slane %v1134_v50, %v1182_v22 }
 0x2dc   : > { %v1198_v40 = vrot.slane %v1134_v50, %v1197_v6  ;;  %v1213_v37 = vrot.slane %v1134_v50, %v1212_v51  ;;  %v1228_v62 = vrot.slane %v1134_v50, %v1227_v55  ;;  %v1243_v53 = vrot.slane %v1134_v50, %v1242_v15 }
 0x2dd   : > { %1144 = vbcast.lane.b32.xlu1 %v1138_v47, 264  ;;  %1140 = vbcast.lane.b32.xlu0 %v1138_v47, 256 }
 0x2e1   : > { %1155 = vbcast.lane.b32.xlu1 %v1153_v54, 256  ;;  %1170 = vbcast.lane.b32.xlu0 %v1168_v14, 256 }
 0x2e5   : > { %1159 = vbcast.lane.b32.xlu1 %v1153_v54, 264  ;;  %1148 = vbcast.lane.b32.xlu0 %v1138_v47, 272 }
 0x2e9   : > { %1174 = vbcast.lane.b32.xlu1 %v1168_v14, 264  ;;  %1185 = vbcast.lane.b32.xlu0 %v1183_v57, 256 }
 0x2ed   : > { %1163 = vbcast.lane.b32.xlu1 %v1153_v54, 272  ;;  %1178 = vbcast.lane.b32.xlu0 %v1168_v14, 272 }
 0x2f1   : > { %1189 = vbcast.lane.b32.xlu1 %v1183_v57, 264  ;;  %1204 = vbcast.lane.b32.xlu0 %v1198_v40, 264 }
 0x2f5   : > { %1200 = vbcast.lane.b32.xlu1 %v1198_v40, 256  ;;  %1215 = vbcast.lane.b32.xlu0 %v1213_v37, 256 }
 0x2f9   : > { %1193 = vbcast.lane.b32.xlu1 %v1183_v57, 272  ;;  %1208 = vbcast.lane.b32.xlu0 %v1198_v40, 272 }
 0x2fd   : > { %1219 = vbcast.lane.b32.xlu1 %v1213_v37, 264  ;;  %1234 = vbcast.lane.b32.xlu0 %v1228_v62, 264 }
 0x301   : > { %1230 = vbcast.lane.b32.xlu1 %v1228_v62, 256  ;;  %1245 = vbcast.lane.b32.xlu0 %v1243_v53, 256 }
 0x305   : > { %1223 = vbcast.lane.b32.xlu1 %v1213_v37, 272  ;;  %1238 = vbcast.lane.b32.xlu0 %v1228_v62, 272 }
 0x309   : > { %1249 = vbcast.lane.b32.xlu1 %v1243_v53, 264 }
 0x30d   : > { %1253 = vbcast.lane.b32.xlu1 %v1243_v53, 272 }
 0x34f   : > { %v1145_v18 = vpop.permute.xlu1 %1144  ;;  %v1141_v3 = vpop.permute.xlu0 %1140 }
 0x350   : > { %v1256_v35 = vmul.f32 %v2030_v58, %v1145_v18  ;;  %v1255_v41 = vmul.f32 %v1141_v3, %v2041_v1 }
 0x352   : > { %v1280_v49 = vsel %vm393_vm0, %v1256_v35, 0.0  ;;  %v1279_v50 = vsel %vm393_vm0, %v1255_v41, 0.0 }
 0x353   : > { %v1156_v63 = vpop.permute.xlu1 %1155  ;;  %v1171_v60 = vpop.permute.xlu0 %1170  ;;  %v1281_v22 = vadd.f32 %v1280_v49, %v1279_v50 }
 0x354   : > { %v1258_v25 = vmul.f32 %v2053_v11, %v1156_v63  ;;  %v1261_v11 = vmul.f32 %v1171_v60, %v2108_v8 }
 0x356   : > { %v1290_v1 = vsel %vm393_vm0, %v1258_v25, 0.0 }
 0x357   : > { %v1160_v5 = vpop.permute.xlu1 %1159  ;;  %v1149_v46 = vpop.permute.xlu0 %1148 }
 0x358   : > { %v1259_v24 = vmul.f32 %v1160_v5, %v2088_v42  ;;  %v1257_v42 = vmul.f32 %v1149_v46, %v2069_v20 }
 0x35a   : > { %v1291_v36 = vsel %vm393_vm0, %v1259_v24, 0.0  ;;  %v1282_v57 = vsel %vm393_vm0, %v1257_v42, 0.0 }
 0x35b   : > { %v1175_v19 = vpop.permute.xlu1 %1174  ;;  %v1186_v10 = vpop.permute.xlu0 %1185  ;;  %v1292_v54 = vadd.f32 %v1291_v36, %v1290_v1  ;;  %v1283_v18 = vadd.f32 %v1282_v57, %v1281_v22 }
 0x35c   : > { %v1262_v30 = vmul.f32 %v2100_v61, %v1175_v19  ;;  %v1264_v61 = vmul.f32 %v2117_v23, %v1186_v10 }
 0x35e   : > { %v1302_v20 = vsel %vm393_vm0, %v1262_v30, 0.0 }
 0x35f   : > { %v1164_v9 = vpop.permute.xlu1 %1163  ;;  %v1179_v27 = vpop.permute.xlu0 %1178 }
 0x360   : > { %v1260_v4 = vmul.f32 %v2078_v29, %v1164_v9  ;;  %v1263_v47 = vmul.f32 %v1179_v27, %v2126_v31  ;;  %v1301_v31 = vsel %vm393_vm0, %v1261_v11, 0.0 }
 0x361   : > { %v1303_v62 = vadd.f32 %v1302_v20, %v1301_v31 }
 0x362   : > { %v1293_v29 = vsel %vm393_vm0, %v1260_v4, 0.0  ;;  %v1304_v51 = vsel %vm393_vm0, %v1263_v47, 0.0 }
 0x363   : > { %v1190_v32 = vpop.permute.xlu1 %1189  ;;  %v1205_v16 = vpop.permute.xlu0 %1204  ;;  %v1294_v6 = vadd.f32 %v1293_v29, %v1292_v54  ;;  %v1305_v5 = vadd.f32 %v1304_v51, %v1303_v62 }
 0x364   : > { %v1265_v58 = vmul.f32 %v1190_v32, %v2143_v0  ;;  %v1268_v23 = vmul.f32 %v2152_v13, %v1205_v16 }
 0x365   : > { %v1295_v60 = vrot.slane %v1294_v6, 4  ;;  %v1306_v41 = vrot.slane %v1305_v5, 4 }
 0x366   : > { %v1313_v8 = vsel %vm393_vm0, %v1265_v58, 0.0 }
 0x367   : > { %v1201_v28 = vpop.permute.xlu1 %1200  ;;  %v1216_v33 = vpop.permute.xlu0 %1215  ;;  %v1296_v35 = vadd.f32 %v1295_v60, %v1294_v6  ;;  %v1307_v42 = vadd.f32 %v1306_v41, %v1305_v5 }
 0x368   : > { %v1267_v0 = vmul.f32 %v1201_v28, %v2164_v44  ;;  %v1312_v44 = vsel %vm393_vm0, %v1264_v61, 0.0  ;;  %v1270_v15 = vmul.f32 %v2032_v59, %v1216_v33  ;;  %v1284_v28 = vrot.slane %v1283_v18, 4 }
 0x369   : > { %v1314_v3 = vadd.f32 %v1313_v8, %v1312_v44  ;;  %v1297_v29 = vrot.slane %v1296_v35, 2  ;;  %v1308_v20 = vrot.slane %v1307_v42, 2 }
 0x36a   : > { %v1334_v32 = vsel %vm393_vm0, %v1270_v15, 0.0  ;;  %v1285_v50 = vadd.f32 %v1284_v28, %v1283_v18 }
 0x36b   : > { %v1194_v39 = vpop.permute.xlu1 %1193  ;;  %v1209_v26 = vpop.permute.xlu0 %1208  ;;  %v1298_v57 = vadd.f32 %v1297_v29, %v1296_v35 }
 0x36c   : > { %v1266_v14 = vmul.f32 %v2134_v43, %v1194_v39  ;;  %v1269_v43 = vmul.f32 %v1209_v26, %v2043_v2  ;;  %v1324_v2 = vsel %vm393_vm0, %v1268_v23, 0.0  ;;  %v1309_v23 = vadd.f32 %v1308_v20, %v1307_v42 }
 0x36e   : > { %v1315_v53 = vsel %vm393_vm0, %v1266_v14, 0.0  ;;  %v1326_v19 = vsel %vm393_vm0, %v1269_v43, 0.0  ;;  %v1286_v14 = vrot.slane %v1285_v50, 2 }
 0x36f   : > { %v1220_v48 = vpop.permute.xlu1 %1219  ;;  %v1235_v52 = vpop.permute.xlu0 %1234  ;;  %v1316_v46 = vadd.f32 %v1315_v53, %v1314_v3  ;;  %v1310_v53 = vrot.slane %v1309_v23, 1 }
 0x370   : > { %v1271_v40 = vmul.f32 %v1220_v48, %v2071_v21  ;;  %v1323_v21 = vsel %vm393_vm0, %v1267_v0, 0.0  ;;  %v1274_v10 = vmul.f32 %v2082_v34, %v1235_v52  ;;  %v1287_v31 = vadd.f32 %v1286_v14, %v1285_v50 }
 0x371   : > { %v1325_v27 = vadd.f32 %v1324_v2, %v1323_v21  ;;  %v1317_v39 = vrot.slane %v1316_v46, 4  ;;  %v1311_v2 = vadd.f32 %v1310_v53, %v1309_v23 }
 0x372   : > { %v1335_v13 = vsel %vm393_vm0, %v1271_v40, 0.0  ;;  %v1346_v34 = vsel %vm393_vm0, %v1274_v10, 0.0  ;;  %v1288_v15 = vrot.slane %v1287_v31, 1 }
 0x373   : > { %v1231_v37 = vpop.permute.xlu1 %1230  ;;  %v1246_v55 = vpop.permute.xlu0 %1245  ;;  %v1336_v33 = vadd.f32 %v1335_v13, %v1334_v32  ;;  %v1327_v25 = vadd.f32 %v1326_v19, %v1325_v27  ;;  %v1318_v47 = vadd.f32 %v1317_v39, %v1316_v46 }
 0x374   : > { %v1273_v63 = vmul.f32 %v1231_v37, %v2098_v56  ;;  %v1289_v13 = vadd.f32 %v1288_v15, %v1287_v31 }
 0x375   : > { %v1328_v58 = vrot.slane %v1327_v25, 4  ;;  %v1319_v6 = vrot.slane %v1318_v47, 2 }
 0x376   : > { %v1345_v24 = vsel %vm393_vm0, %v1273_v63, 0.0 }
 0x377   : > { %v1224_v59 = vpop.permute.xlu1 %1223  ;;  %v1239_v9 = vpop.permute.xlu0 %1238  ;;  %v1347_v49 = vadd.f32 %v1346_v34, %v1345_v24  ;;  %v1320_v62 = vadd.f32 %v1319_v6, %v1318_v47 }
 0x378   : > { %v1272_v16 = vmul.f32 %v2055_v12, %v1224_v59  ;;  %v1275_v56 = vmul.f32 %v1239_v9, %v2130_v38  ;;  %v1276_v12 = vmul.f32 %v2113_v17, %v1246_v55  ;;  %v1329_v17 = vadd.f32 %v1328_v58, %v1327_v25 }
 0x379   : > { %v1299_v55 = vrot.slane %v1298_v57, 1  ;;  %v1321_v63 = vrot.slane %v1320_v62, 1 }
 0x37a   : > { %v1337_v4 = vsel %vm393_vm0, %v1272_v16, 0.0  ;;  %v1348_v36 = vsel %vm393_vm0, %v1275_v56, 0.0  ;;  %v1356_v54 = vsel %vm393_vm0, %v1276_v12, 0.0  ;;  %v1330_v43 = vrot.slane %v1329_v17, 2 }
 0x37b   : > { %v1338_v26 = vadd.f32 %v1337_v4, %v1336_v33  ;;  %v1250_v30 = vpop.permute.xlu1 %1249  ;;  %v1349_v1 = vadd.f32 %v1348_v36, %v1347_v49  ;;  %v1300_v21 = vadd.f32 %v1299_v55, %v1298_v57  ;;  %v1322_v59 = vadd.f32 %v1321_v63, %v1320_v62  ;;  %v1612_v36 = vld [vmem:[%s2396_s6] ss:$0 sm:$0xff] }
 0x37c   : > { %v1277_v38 = vmul.f32 %v1250_v30, %v2178_v7  ;;  %v1331_v18 = vadd.f32 %v1330_v43, %v1329_v17  ;;  %v1464_v49 = vld [vmem:[%s359_s25] sm:$0xff]  ;;  %s1823_s25 = smov [#allocation2]  }
 0x37d   : > { %v1339_v48 = vrot.slane %v1338_v26, 4  ;;  %v1350_v0 = vrot.slane %v1349_v1, 4  ;;  %v1375_v10 = vsel %vm1107_vm12, %v1300_v21, %v1289_v13  ;;  %s1762_s26 = sshll.u32 %s1823_s25, 4  ;;  %s1763_s26 = int_to_ptr.vmem [resolvable:$false] %s1762_s26 }
 0x37e   : > { %v1357_v11 = vsel %vm393_vm0, %v1277_v38, 0.0  ;;  %v1332_v46 = vrot.slane %v1331_v18, 1  ;;  %v1376_v56 = vsel %vm1109_vm13, %v1311_v2, %v1375_v10  ;;  %s1764_s9 = scalar_lea.vmem %s1763_s26, 256  ;;  %p1765_p1 = scmp.lt.s32.totalorder %s1482_s17, %s1763_s26 }
 0x37f   : > { %v1254_v52 = vpop.permute.xlu1 %1253  ;;  %v1358_v22 = vadd.f32 %v1357_v11, %v1356_v54  ;;  %v1340_v8 = vadd.f32 %v1339_v48, %v1338_v26  ;;  %v1351_v37 = vadd.f32 %v1350_v0, %v1349_v1  ;;  %v1377_v24 = vsel %vm1111_vm14, %v1322_v59, %v1376_v56  ;;  %p1766_p2 = scmp.lt.s32.totalorder %s1764_s9, %s1758_s24 }
 0x380   : > { %v1278_v61 = vmul.f32 %v2166_v45, %v1254_v52  ;;  %v1333_v32 = vadd.f32 %v1332_v46, %v1331_v18 }
 0x381   : > { %v1341_v44 = vrot.slane %v1340_v8, 2  ;;  %v1352_v3 = vrot.slane %v1351_v37, 2  ;;  %p1767_p3 = por %p1766_p2, %p1765_p1 }
 0x382   : > { %v1359_v7 = vsel %vm393_vm0, %v1278_v61, 0.0  ;;  %v1378_v41 = vsel %vm1113_vm15, %v1333_v32, %v1377_v24 }
 0x383   : > { %v1360_v40 = vadd.f32 %v1359_v7, %v1358_v22  ;;  %v1342_v60 = vadd.f32 %v1341_v44, %v1340_v8  ;;  %v1353_v19 = vadd.f32 %v1352_v3, %v1351_v37  ;;  %p1768_p4 = pnand %p1767_p3, %p1761_p0 }
 0x385   : > { %v1361_v51 = vrot.slane %v1360_v40, 4  ;;  %v1343_v9 = vrot.slane %v1342_v60, 1  ;;  %v1354_v16 = vrot.slane %v1353_v19, 1 }
 0x387   : > { %v1362_v45 = vadd.f32 %v1361_v51, %v1360_v40  ;;  %v1344_v28 = vadd.f32 %v1343_v9, %v1342_v60  ;;  %v1355_v35 = vadd.f32 %v1354_v16, %v1353_v19 }
 0x389   : > { %v1363_v5 = vrot.slane %v1362_v45, 2  ;;  %v1379_v4 = vsel %vm1115_vm1, %v1344_v28, %v1378_v41 }
 0x38a   : > { %v1380_v39 = vsel %vm1117_vm2, %v1355_v35, %v1379_v4 }
 0x38b   : > { %v1364_v27 = vadd.f32 %v1363_v5, %v1362_v45 }
 0x38d   : > { %v1365_v33 = vrot.slane %v1364_v27, 1 }
 0x38f   : > { %v1366_v25 = vadd.f32 %v1365_v33, %v1364_v27 }
 0x391   : > { %v1381_v34 = vsel %vm1119_vm3, %v1366_v25, %v1380_v39 }
 0x39b   : > { %v1452_v26 = vpop.f32.mrf.mxu1 }
 0x39c   : > { %v1453_v30 = vadd.f32 %v1452_v26, %v1381_v34 }
 0x39d   : > { %v1701_v12 = vpop.f32.mrf.mxu1 }
 0x39e   : > { %v1463_v38 = vadd.f32 %v1612_v36, %v1453_v30 }
 0x3a0   : > { %v1465_v50 = vadd.f32 %v1464_v49, %v1463_v38 }
 0x3a2   : > { %1466 = vst.msk [vmem:[%s340_s13] sm:$0xff] %vm393_vm0, %v1465_v50 }
 0x3a3   : > { %1771 = shalt.err (!%p1768_p4)
}
 0x3a4   : > { %s1772_s22 = scalar_lea.hbm %s1479_s20, 128  ;;  %s1776_s12 = scalar_lea.hbm %s2398_s8, 384 }
 0x3a5   : > { %p1773_p7 = scmp.ne.s32.totalorder %s1479_s20, %s1772_s22  ;;  %p1777_p10 = scmp.lt.s32.totalorder %s1479_s20, %s2398_s8 }
 0x3a6   : > { %p1778_p11 = scmp.lt.s32.totalorder %s1776_s12, %s1772_s22 }
 0x3a7   : > { %p1774_p8 = pnand %p1773_p7, %p1907_p5 }
 0x3a8   : > { %p1779_p12 = por %p1778_p11, %p1777_p10 }
 0x3a9   : > { %p1775_p9 = pneg %p1774_p8 }
 0x3ab   : > { %p1780_p13 = pnand %p1779_p12, %p1775_p9 }
 0x3ad   : > { %1783 = shalt.err (!%p1780_p13)
}
 0x3ae   : > { %1711 = dma.vmem_to_hbm [thread:$0]  (%p1907_p5), %s1482_s17, 128, %s1479_s20, %s1468_s23  }
 0x3af PF: > { %p1717_p0 = scmp.ge.s32.totalorder %s1818_s30, 2  ;;  %s1493_s18 = sand.u32 1, %s1806_s27  }
 0x3b0   : > { %s1494_s24 = scalar_lea.sflag [#allocation3], %s1493_s18 }
 0x3b1   : > { %p1714_p1 = pnand %p1717_p0, %p1911_p6 }
 0x3b3   : > { %p1715_p2 = pneg %p1714_p1 }
 0x3b5   : > { %1801 = dma.done.wait (%p1715_p2), %s1494_s24, 128  }
 0x3b6   : > { %1803 = vsyncadd (%p1715_p2), %s1494_s24, 4294967168  ;;  %p18_p3 = scmp.ge.s32.totalorder %s1894_s11, 5   ;;  %s2401_s27 = smov %s1810_s28 }
 0x3b7   : > { %s2402_s28 = smov %s1814_s29  ;;  %s2403_s29 = smov %s1905_s14 }
 0x3b8   : > { %s2404_s30 = smov %s1894_s11  ;;  %20 = sbr.rel (!%p18_p3) target bundleno = 3 (0x3), region = 96 }
 0x3bd   :  { %1499 = vsyncpa [#allocation3], 1 }
 0x3be   :  { %1501 = vsyncpa [#allocation3 + $0x1], 1 }

</bundles_post_ra>
